<compile_context>
chip_gen: v5e
topology: v5e:2x2
jax: 0.10.0
libtpu: 0.0.40
codegen_flags: <defaults>
</compile_context>

<pallas_src>
import jax
import jax.numpy as jnp
from jax import lax
from jax.experimental import pallas as pl
from jax.experimental.pallas import tpu as pltpu

# ----------------------------- config ---------------------------------------
B = 2               # batch
L = 8               # sequence length
H = 32              # Config.HIDDEN_SIZE (small synthetic value)
NUM_HEADS = 8
HEAD_DIM = H // NUM_HEADS
CONV_CH = 256
CONV_TAPS = 5       # conv1 (k=3) aligned into the conv2 (k=5) tap window
NUM_CLASSES = 4
PAD_OUT = 128       # lane-padded classifier output
VOCAB = 100
LN_EPS = 1e-5

_vmem = pl.BlockSpec(memory_space=pltpu.MemorySpace.VMEM)


def _layernorm(h, gamma, beta):
    mu = jnp.mean(h, axis=-1, keepdims=True)
    var = jnp.mean((h - mu) ** 2, axis=-1, keepdims=True)
    return (h - mu) * lax.rsqrt(var + LN_EPS) * gamma + beta


# -------------------- single fused forward kernel ----------------------------
def fused_head_kernel(xl_ref, pm_ref, ap_ref, convw_ref,
                      fw1_ref, fw2_ref, fw3_ref, vecs_ref,
                      out_ref, xpad_ref):
    # ---- unpack activations --------------------------------------------------
    xl = xl_ref[...]                              # (B, L, 2H) : x_mean | lhs
    x = xl[:, :, :H]                              # weighted_hidden   (B, L, H)
    lhs = xl[:, :, H:]                            # last_hidden_state (B, L, H)

    pm = pm_ref[...]                              # (B, H + NH*L) : pooled | mask_tiled
    pooled = pm[:, :H]                            # (B, H)
    mask_t = pm[:, H:]                            # (B, NH*L) key mask, head-major
    mask = pm[:, H:H + L]                         # (B, L)

    # ---- unpack constants (static ref slices, no per-call iota work) ---------
    w_qkvo = ap_ref[0:H, :]                       # (32, 128) : Wq|Wk|Wv|Wo
    sel_t = ap_ref[H:H + NUM_HEADS, :H]           # (NH, H)  head selector
    gsum_m = ap_ref[H + NUM_HEADS:, :NUM_HEADS]   # (NH*L, NH) group-sum matrix

    conv_b = vecs_ref[0:1, :]                     # (1, 512)
    fb2 = vecs_ref[1:2, :]
    g2 = vecs_ref[2:3, :]
    be2 = vecs_ref[3:4, :]
    b_qkvo = vecs_ref[4:5, :4 * H]                # (1, 128)
    fb1 = vecs_ref[5:6, :H]
    g1 = vecs_ref[6:7, :H]
    be1 = vecs_ref[7:8, :H]
    fb3 = vecs_ref[8:9, :PAD_OUT]                 # (1, 128)

    # ---- conv branch: 5 shifted accumulated bf16 matmuls (no lane concat) ----
    xpad_ref[...] = jnp.zeros((B, L + 4, H), jnp.float32)
    xpad_ref[:, 2:2 + L, :] = x
    conv = jnp.zeros((B * L, 2 * CONV_CH), jnp.float32)
    for t in range(CONV_TAPS):
        lhs_t = xpad_ref[:, t:t + L, :].reshape(B * L, H).astype(jnp.bfloat16)
        conv = conv + jnp.dot(lhs_t, convw_ref[t],
                              preferred_element_type=jnp.float32)
    conv = jnp.maximum(conv + conv_b, 0.0).reshape(B, L, 2 * CONV_CH)
    conv_feat = jnp.max(conv, axis=1)             # (B, 512)

    # ---- multihead self-attention (fused QKV, no p_full expansion) -----------
    x2d = x.reshape(B * L, H)
    qkv = jnp.dot(x2d, w_qkvo, preferred_element_type=jnp.float32) + b_qkvo
    q = qkv[:, 0 * H:1 * H].reshape(B, L, H)
    k = qkv[:, 1 * H:2 * H].reshape(B, L, H)
    v = qkv[:, 2 * H:3 * H].reshape(B, L, H)

    # block-expanded K / V: [b, h*L + j, d] = {k,v}[b, j, d] * (head(d) == h)
    k_blk = (k[:, None, :, :] * sel_t[None, :, None, :]).reshape(B, NUM_HEADS * L, H)
    v_blk = (v[:, None, :, :] * sel_t[None, :, None, :]).reshape(B, NUM_HEADS * L, H)

    scale = 1.0 / float(HEAD_DIM) ** 0.5
    scores = jnp.einsum('bqd,bmd->bqm', q, k_blk,
                        preferred_element_type=jnp.float32) * scale  # (B,Lq,NH*L)
    scores = scores + ((mask_t - 1.0) * 1e9)[:, None, :]   # key_padding_mask bias
    # per-(b,q) max is constant across each head's key group -> softmax-exact;
    # score spreads here are tiny so no cross-head underflow risk.
    scores = scores - jnp.max(scores, axis=-1, keepdims=True)
    e = jnp.exp(scores)                                    # masked keys -> 0.0

    # per-(b,q,head) denominators via one tiny constant matmul
    gs = jnp.dot(e.reshape(B * L, NUM_HEADS * L), gsum_m,
                 preferred_element_type=jnp.float32)       # (B*L, NH)
    inv = pl.reciprocal(gs, approx=True)
    inv_full = jnp.dot(inv, sel_t,
                       preferred_element_type=jnp.float32).reshape(B, L, H)

    ctx = jnp.einsum('bqm,bmd->bqd', e, v_blk,
                     preferred_element_type=jnp.float32)   # (B, Lq, H)
    attn = ctx * inv_full
    attended = (jnp.dot(attn.reshape(B * L, H), w_qkvo[:, 3 * H:],
                        preferred_element_type=jnp.float32)
                + b_qkvo[:, 3 * H:]).reshape(B, L, H)

    # ---- masked poolings (reference semantics: multiply by mask, then max/avg)
    m3 = mask[:, :, None]                                  # (B, L, 1)
    masked_att = attended * m3
    max_pooled = jnp.max(masked_att, axis=1)               # (B, H)
    inv_cnt = pl.reciprocal(jnp.sum(mask, axis=1, keepdims=True), approx=True)
    avg_pooled = jnp.sum(masked_att, axis=1) * inv_cnt     # (B, H)
    lhs_max = jnp.max(lhs * m3, axis=1)                    # (B, H)

    # ---- feature fusion + classifier: fw1 split by rows -> 5 accumulated dots
    def bdot(a, w):
        return jnp.dot(a.astype(jnp.bfloat16), w,
                       preferred_element_type=jnp.float32)

    h1 = (bdot(pooled, fw1_ref[0:H, :])
          + bdot(max_pooled, fw1_ref[H:2 * H, :])
          + bdot(avg_pooled, fw1_ref[2 * H:3 * H, :])
          + bdot(lhs_max, fw1_ref[3 * H:4 * H, :])
          + bdot(conv_feat, fw1_ref[4 * H:, :])
          + fb1)
    h1 = jnp.maximum(_layernorm(h1, g1, be1), 0.0)
    h2 = bdot(h1, fw2_ref[...]) + fb2
    h2 = jnp.maximum(_layernorm(h2, g2, be2), 0.0)
    out_ref[...] = bdot(h2, fw3_ref[...]) + fb3            # (B, 128) lane-dense


def fused_head(xl, pm, params):
    return pl.pallas_call(
        fused_head_kernel,
        out_shape=jax.ShapeDtypeStruct((B, PAD_OUT), jnp.float32),
        in_specs=[_vmem] * 8,
        out_specs=_vmem,
        scratch_shapes=[pltpu.VMEM((B, L + 4, H), jnp.float32)],
    )(xl, pm, params["attn_pack"], params["conv_w"],
      params["fw1"], params["fw2"], params["fw3"], params["vecs"])


# ------------------------------ glue / weights -------------------------------
def make_params(key):
    ks = iter(jax.random.split(key, 64))
    n = lambda shape, s=0.05: jax.random.normal(next(ks), shape, jnp.float32) * s

    p = {}
    # synthetic BERT stand-in
    p["emb"] = n((VOCAB, H), 0.1)
    p["enc_w"] = [n((H, H)) for _ in range(4)]
    p["enc_b"] = [n((1, H)) for _ in range(4)]
    p["pool_w"] = n((H, H))
    p["pool_b"] = n((1, H))

    # conv branch: conv1 (k=3,p=1) zero-padded to 5 taps, concatenated with
    # conv2 (k=5,p=2) along C_out -> (5, H, 512), stored bf16 (MXU operand).
    conv1_w = n((3, H, CONV_CH))
    conv2_w = n((5, H, CONV_CH))
    conv1_w5 = jnp.pad(conv1_w, ((1, 1), (0, 0), (0, 0)))
    p["conv_w"] = jnp.concatenate([conv1_w5, conv2_w], axis=-1).astype(jnp.bfloat16)
    conv_b = jnp.concatenate([n((CONV_CH,)), n((CONV_CH,))])        # (512,)

    # attention: packed QKVO weight + host-precomputed selector constants
    wq, wk, wv, wo = n((H, H)), n((H, H)), n((H, H)), n((H, H))
    bq, bk, bv, bo = n((H,)), n((H,)), n((H,)), n((H,))
    w_qkvo = jnp.concatenate([wq, wk, wv, wo], axis=1)              # (32, 128)
    b_qkvo = jnp.concatenate([bq, bk, bv, bo])                      # (128,)
    d = jnp.arange(H)
    sel_t = (d[None, :] // HEAD_DIM
             == jnp.arange(NUM_HEADS)[:, None]).astype(jnp.float32)       # (NH, H)
    m = jnp.arange(NUM_HEADS * L)
    gsum = (m[:, None] // L
            == jnp.arange(NUM_HEADS)[None, :]).astype(jnp.float32)        # (NH*L, NH)
    p["attn_pack"] = jnp.concatenate(
        [w_qkvo,
         jnp.pad(sel_t, ((0, 0), (0, 4 * H - H))),
         jnp.pad(gsum, ((0, 0), (0, 4 * H - NUM_HEADS)))], axis=0)   # (104, 128)

    # fusion + classifier (large weights bf16; fw3 lane-padded to 128 outputs)
    fin = 4 * H + 2 * CONV_CH
    p["fw1"] = n((fin, H)).astype(jnp.bfloat16)                      # (640, 32)
    fb1 = n((H,))
    g1, be1 = jnp.ones((H,), jnp.float32), jnp.zeros((H,), jnp.float32)
    p["fw2"] = n((H, 512)).astype(jnp.bfloat16)                      # (32, 512)
    fb2 = n((512,))
    g2, be2 = jnp.ones((512,), jnp.float32), jnp.zeros((512,), jnp.float32)
    fw3 = n((512, NUM_CLASSES))
    p["fw3"] = jnp.pad(fw3, ((0, 0), (0, PAD_OUT - NUM_CLASSES))).astype(jnp.bfloat16)
    fb3 = jnp.pad(n((NUM_CLASSES,)), (0, PAD_OUT - NUM_CLASSES))     # (128,)

    def row(v):                                   # one 512-lane row per vector
        return jnp.pad(v, (0, 2 * CONV_CH - v.shape[0]))[None, :]
    p["vecs"] = jnp.concatenate(
        [row(conv_b), row(fb2), row(g2), row(be2), row(b_qkvo),
         row(fb1), row(g1), row(be1), row(fb3)], axis=0)             # (9, 512)
    return p


def synthetic_bert(input_ids, params):
    """Deterministic stand-in producing BERT-shaped outputs (plain JAX glue)."""
    h = params["emb"][input_ids]                                     # (B, L, H)
    hidden_states = [h]
    for w, b in zip(params["enc_w"], params["enc_b"]):
        h = jnp.tanh(jnp.einsum("blh,hd->bld", h, w) + b)
        hidden_states.append(h)
    last_hidden_state = hidden_states[-1]
    pooler_output = jnp.tanh(last_hidden_state[:, 0, :] @ params["pool_w"]
                             + params["pool_b"])                     # (B, H)
    return last_hidden_state, pooler_output, hidden_states


@jax.jit
def news_classifier_forward(input_ids, attention_mask, params):
    lhs, pooled, hidden_states = synthetic_bert(input_ids, params)
    # mean of last-4 layers computed in the XLA producer (no (4,B,L,H) stack);
    # activations packed into two lane-dense arrays for the kernel.
    x_mean = (hidden_states[-4] + hidden_states[-3]
              + hidden_states[-2] + hidden_states[-1]) * 0.25
    xl = jnp.concatenate([x_mean, lhs], axis=-1)                     # (B, L, 2H)
    mask_t = jnp.tile(attention_mask, (1, NUM_HEADS))                # (B, NH*L)
    pm = jnp.concatenate([pooled, mask_t], axis=-1)                  # (B, H+NH*L)
    logits_pad = fused_head(xl, pm, params)                          # (B, 128)
    return logits_pad[:, :NUM_CLASSES]


# --------------------------------- main --------------------------------------
if __name__ == "__main__":
    key = jax.random.PRNGKey(0)
    k_ids, k_par = jax.random.split(key)

    input_ids = jax.random.randint(k_ids, (B, L), 0, VOCAB, dtype=jnp.int32)
    attention_mask = jnp.array(
        [[1, 1, 1, 1, 1, 1, 1, 1],
         [1, 1, 1, 1, 1, 1, 0, 0]], dtype=jnp.float32)

    params = make_params(k_par)

    logits = news_classifier_forward(input_ids, attention_mask, params)
    jax.block_until_ready(logits)
    assert logits.shape == (B, NUM_CLASSES)
    print("KERNEL_OK")
</pallas_src>

<mosaic_0001>
module attributes {stable_mosaic.version = 11 : i64} {
  func.func @fused_head_kernel(%arg0: memref<2x8x64xf32, #tpu.memory_space<vmem>>, %arg1: memref<2x96xf32, #tpu.memory_space<vmem>>, %arg2: memref<104x128xf32, #tpu.memory_space<vmem>>, %arg3: memref<5x32x512xbf16, #tpu.memory_space<vmem>>, %arg4: memref<640x32xbf16, #tpu.memory_space<vmem>>, %arg5: memref<32x512xbf16, #tpu.memory_space<vmem>>, %arg6: memref<512x128xbf16, #tpu.memory_space<vmem>>, %arg7: memref<9x512xf32, #tpu.memory_space<vmem>>, %arg8: memref<2x128xf32, #tpu.memory_space<vmem>>, %arg9: memref<2x12x32xf32, #tpu.memory_space<vmem>>) attributes {dimension_semantics = [], scalar_prefetch = 0 : i64, scratch_operands = 1 : i64, tpu.core_type = #tpu.core_type<tc>} {
    %c0 = arith.constant 0 : index
    %c0_0 = arith.constant 0 : index
    %c0_1 = arith.constant 0 : index
    %0 = vector.load %arg0[%c0, %c0_0, %c0_1] : memref<2x8x64xf32, #tpu.memory_space<vmem>>, vector<2x8x64xf32>
    %1 = vector.extract_strided_slice %0 {offsets = [0, 0, 0], sizes = [2, 8, 32], strides = [1, 1, 1]} : vector<2x8x64xf32> to vector<2x8x32xf32>
    %2 = vector.extract_strided_slice %0 {offsets = [0, 0, 32], sizes = [2, 8, 32], strides = [1, 1, 1]} : vector<2x8x64xf32> to vector<2x8x32xf32>
    %c0_2 = arith.constant 0 : index
    %c0_3 = arith.constant 0 : index
    %3 = vector.load %arg1[%c0_2, %c0_3] : memref<2x96xf32, #tpu.memory_space<vmem>>, vector<2x96xf32>
    %4 = vector.extract_strided_slice %3 {offsets = [0, 0], sizes = [2, 32], strides = [1, 1]} : vector<2x96xf32> to vector<2x32xf32>
    %5 = vector.extract_strided_slice %3 {offsets = [0, 32], sizes = [2, 64], strides = [1, 1]} : vector<2x96xf32> to vector<2x64xf32>
    %6 = vector.extract_strided_slice %3 {offsets = [0, 32], sizes = [2, 8], strides = [1, 1]} : vector<2x96xf32> to vector<2x8xf32>
    %c0_4 = arith.constant 0 : index
    %c0_5 = arith.constant 0 : index
    %7 = vector.load %arg2[%c0_4, %c0_5] : memref<104x128xf32, #tpu.memory_space<vmem>>, vector<32x128xf32>
    %c32 = arith.constant 32 : index
    %c0_6 = arith.constant 0 : index
    %8 = vector.load %arg2[%c32, %c0_6] : memref<104x128xf32, #tpu.memory_space<vmem>>, vector<8x32xf32>
    %c40 = arith.constant 40 : index
    %c0_7 = arith.constant 0 : index
    %9 = vector.load %arg2[%c40, %c0_7] : memref<104x128xf32, #tpu.memory_space<vmem>>, vector<64x8xf32>
    %c0_8 = arith.constant 0 : index
    %c0_9 = arith.constant 0 : index
    %10 = vector.load %arg7[%c0_8, %c0_9] : memref<9x512xf32, #tpu.memory_space<vmem>>, vector<1x512xf32>
    %c1 = arith.constant 1 : index
    %c0_10 = arith.constant 0 : index
    %11 = vector.load %arg7[%c1, %c0_10] : memref<9x512xf32, #tpu.memory_space<vmem>>, vector<1x512xf32>
    %c2 = arith.constant 2 : index
    %c0_11 = arith.constant 0 : index
    %12 = vector.load %arg7[%c2, %c0_11] : memref<9x512xf32, #tpu.memory_space<vmem>>, vector<1x512xf32>
    %c3 = arith.constant 3 : index
    %c0_12 = arith.constant 0 : index
    %13 = vector.load %arg7[%c3, %c0_12] : memref<9x512xf32, #tpu.memory_space<vmem>>, vector<1x512xf32>
    %c4 = arith.constant 4 : index
    %c0_13 = arith.constant 0 : index
    %14 = vector.load %arg7[%c4, %c0_13] : memref<9x512xf32, #tpu.memory_space<vmem>>, vector<1x128xf32>
    %c5 = arith.constant 5 : index
    %c0_14 = arith.constant 0 : index
    %15 = vector.load %arg7[%c5, %c0_14] : memref<9x512xf32, #tpu.memory_space<vmem>>, vector<1x32xf32>
    %c6 = arith.constant 6 : index
    %c0_15 = arith.constant 0 : index
    %16 = vector.load %arg7[%c6, %c0_15] : memref<9x512xf32, #tpu.memory_space<vmem>>, vector<1x32xf32>
    %c7 = arith.constant 7 : index
    %c0_16 = arith.constant 0 : index
    %17 = vector.load %arg7[%c7, %c0_16] : memref<9x512xf32, #tpu.memory_space<vmem>>, vector<1x32xf32>
    %c8 = arith.constant 8 : index
    %c0_17 = arith.constant 0 : index
    %18 = vector.load %arg7[%c8, %c0_17] : memref<9x512xf32, #tpu.memory_space<vmem>>, vector<1x128xf32>
    %cst = arith.constant 0.000000e+00 : f32
    %19 = vector.broadcast %cst : f32 to vector<2x12x32xf32>
    %c0_18 = arith.constant 0 : index
    %c0_19 = arith.constant 0 : index
    %c0_20 = arith.constant 0 : index
    %20 = vector.load %arg9[%c0_18, %c0_19, %c0_20] : memref<2x12x32xf32, #tpu.memory_space<vmem>>, vector<2x12x32xf32>
    tpu.vector_store %arg9[%c0_18, %c0_19, %c0_20], %19 {strides = array<i32>} : memref<2x12x32xf32, #tpu.memory_space<vmem>>, vector<2x12x32xf32>,
    %c0_21 = arith.constant 0 : index
    %c2_22 = arith.constant 2 : index
    %c0_23 = arith.constant 0 : index
    %21 = vector.load %arg9[%c0_21, %c2_22, %c0_23] : memref<2x12x32xf32, #tpu.memory_space<vmem>>, vector<2x8x32xf32>
    tpu.vector_store %arg9[%c0_21, %c2_22, %c0_23], %1 {strides = array<i32>} : memref<2x12x32xf32, #tpu.memory_space<vmem>>, vector<2x8x32xf32>,
    %cst_24 = arith.constant 0.000000e+00 : f32
    %22 = vector.broadcast %cst_24 : f32 to vector<16x512xf32>
    %c0_25 = arith.constant 0 : index
    %c0_26 = arith.constant 0 : index
    %c0_27 = arith.constant 0 : index
    %23 = vector.load %arg9[%c0_25, %c0_26, %c0_27] : memref<2x12x32xf32, #tpu.memory_space<vmem>>, vector<2x8x32xf32>
    %24 = vector.shape_cast %23 : vector<2x8x32xf32> to vector<16x32xf32>
    %25 = arith.truncf %24 : vector<16x32xf32> to vector<16x32xbf16>
    %c0_28 = arith.constant 0 : index
    %c0_29 = arith.constant 0 : index
    %c0_30 = arith.constant 0 : index
    %26 = vector.load %arg3[%c0_28, %c0_29, %c0_30] : memref<5x32x512xbf16, #tpu.memory_space<vmem>>, vector<1x32x512xbf16>
    %27 = vector.shape_cast %26 : vector<1x32x512xbf16> to vector<32x512xbf16>
    %cst_31 = arith.constant dense<0.000000e+00> : vector<16x512xf32>
    %28 = tpu.matmul %25, %27, %cst_31 {dimension_numbers = #tpu.dot_dimension_numbers<[1], [0], [0], [1], [0, 0, 1, 1], [], []>} : vector<16x32xbf16>, vector<32x512xbf16>, vector<16x512xf32> -> vector<16x512xf32>
    %29 = arith.addf %22, %28 : vector<16x512xf32>
    %c0_32 = arith.constant 0 : index
    %c1_33 = arith.constant 1 : index
    %c0_34 = arith.constant 0 : index
    %30 = vector.load %arg9[%c0_32, %c1_33, %c0_34] : memref<2x12x32xf32, #tpu.memory_space<vmem>>, vector<2x8x32xf32>
    %31 = vector.shape_cast %30 : vector<2x8x32xf32> to vector<16x32xf32>
    %32 = arith.truncf %31 : vector<16x32xf32> to vector<16x32xbf16>
    %c1_35 = arith.constant 1 : index
    %c0_36 = arith.constant 0 : index
    %c0_37 = arith.constant 0 : index
    %33 = vector.load %arg3[%c1_35, %c0_36, %c0_37] : memref<5x32x512xbf16, #tpu.memory_space<vmem>>, vector<1x32x512xbf16>
    %34 = vector.shape_cast %33 : vector<1x32x512xbf16> to vector<32x512xbf16>
    %cst_38 = arith.constant dense<0.000000e+00> : vector<16x512xf32>
    %35 = tpu.matmul %32, %34, %cst_38 {dimension_numbers = #tpu.dot_dimension_numbers<[1], [0], [0], [1], [0, 0, 1, 1], [], []>} : vector<16x32xbf16>, vector<32x512xbf16>, vector<16x512xf32> -> vector<16x512xf32>
    %36 = arith.addf %29, %35 : vector<16x512xf32>
    %c0_39 = arith.constant 0 : index
    %c2_40 = arith.constant 2 : index
    %c0_41 = arith.constant 0 : index
    %37 = vector.load %arg9[%c0_39, %c2_40, %c0_41] : memref<2x12x32xf32, #tpu.memory_space<vmem>>, vector<2x8x32xf32>
    %38 = vector.shape_cast %37 : vector<2x8x32xf32> to vector<16x32xf32>
    %39 = arith.truncf %38 : vector<16x32xf32> to vector<16x32xbf16>
    %c2_42 = arith.constant 2 : index
    %c0_43 = arith.constant 0 : index
    %c0_44 = arith.constant 0 : index
    %40 = vector.load %arg3[%c2_42, %c0_43, %c0_44] : memref<5x32x512xbf16, #tpu.memory_space<vmem>>, vector<1x32x512xbf16>
    %41 = vector.shape_cast %40 : vector<1x32x512xbf16> to vector<32x512xbf16>
    %cst_45 = arith.constant dense<0.000000e+00> : vector<16x512xf32>
    %42 = tpu.matmul %39, %41, %cst_45 {dimension_numbers = #tpu.dot_dimension_numbers<[1], [0], [0], [1], [0, 0, 1, 1], [], []>} : vector<16x32xbf16>, vector<32x512xbf16>, vector<16x512xf32> -> vector<16x512xf32>
    %43 = arith.addf %36, %42 : vector<16x512xf32>
    %c0_46 = arith.constant 0 : index
    %c3_47 = arith.constant 3 : index
    %c0_48 = arith.constant 0 : index
    %44 = vector.load %arg9[%c0_46, %c3_47, %c0_48] : memref<2x12x32xf32, #tpu.memory_space<vmem>>, vector<2x8x32xf32>
    %45 = vector.shape_cast %44 : vector<2x8x32xf32> to vector<16x32xf32>
    %46 = arith.truncf %45 : vector<16x32xf32> to vector<16x32xbf16>
    %c3_49 = arith.constant 3 : index
    %c0_50 = arith.constant 0 : index
    %c0_51 = arith.constant 0 : index
    %47 = vector.load %arg3[%c3_49, %c0_50, %c0_51] : memref<5x32x512xbf16, #tpu.memory_space<vmem>>, vector<1x32x512xbf16>
    %48 = vector.shape_cast %47 : vector<1x32x512xbf16> to vector<32x512xbf16>
    %cst_52 = arith.constant dense<0.000000e+00> : vector<16x512xf32>
    %49 = tpu.matmul %46, %48, %cst_52 {dimension_numbers = #tpu.dot_dimension_numbers<[1], [0], [0], [1], [0, 0, 1, 1], [], []>} : vector<16x32xbf16>, vector<32x512xbf16>, vector<16x512xf32> -> vector<16x512xf32>
    %50 = arith.addf %43, %49 : vector<16x512xf32>
    %c0_53 = arith.constant 0 : index
    %c4_54 = arith.constant 4 : index
    %c0_55 = arith.constant 0 : index
    %51 = vector.load %arg9[%c0_53, %c4_54, %c0_55] : memref<2x12x32xf32, #tpu.memory_space<vmem>>, vector<2x8x32xf32>
    %52 = vector.shape_cast %51 : vector<2x8x32xf32> to vector<16x32xf32>
    %53 = arith.truncf %52 : vector<16x32xf32> to vector<16x32xbf16>
    %c4_56 = arith.constant 4 : index
    %c0_57 = arith.constant 0 : index
    %c0_58 = arith.constant 0 : index
    %54 = vector.load %arg3[%c4_56, %c0_57, %c0_58] : memref<5x32x512xbf16, #tpu.memory_space<vmem>>, vector<1x32x512xbf16>
    %55 = vector.shape_cast %54 : vector<1x32x512xbf16> to vector<32x512xbf16>
    %cst_59 = arith.constant dense<0.000000e+00> : vector<16x512xf32>
    %56 = tpu.matmul %53, %55, %cst_59 {dimension_numbers = #tpu.dot_dimension_numbers<[1], [0], [0], [1], [0, 0, 1, 1], [], []>} : vector<16x32xbf16>, vector<32x512xbf16>, vector<16x512xf32> -> vector<16x512xf32>
    %57 = arith.addf %50, %56 : vector<16x512xf32>
    %58 = vector.broadcast %10 : vector<1x512xf32> to vector<16x512xf32>
    %59 = arith.addf %57, %58 : vector<16x512xf32>
    %cst_60 = arith.constant 0.000000e+00 : f32
    %60 = vector.broadcast %cst_60 : f32 to vector<16x512xf32>
    %61 = arith.maximumf %59, %60 : vector<16x512xf32>
    %62 = vector.shape_cast %61 : vector<16x512xf32> to vector<2x8x512xf32>
    %cst_61 = arith.constant dense<0xFF800000> : vector<2x512xf32>
    %63 = vector.multi_reduction <maximumf>, %62, %cst_61 [1] : vector<2x8x512xf32> to vector<2x512xf32>
    %64 = vector.shape_cast %1 : vector<2x8x32xf32> to vector<16x32xf32>
    %cst_62 = arith.constant dense<0.000000e+00> : vector<16x128xf32>
    %65 = tpu.matmul %64, %7, %cst_62 {dimension_numbers = #tpu.dot_dimension_numbers<[1], [0], [0], [1], [0, 0, 1, 1], [], []>} : vector<16x32xf32>, vector<32x128xf32>, vector<16x128xf32> -> vector<16x128xf32>
    %66 = vector.broadcast %14 : vector<1x128xf32> to vector<16x128xf32>
    %67 = arith.addf %65, %66 : vector<16x128xf32>
    %68 = vector.extract_strided_slice %67 {offsets = [0, 0], sizes = [16, 32], strides = [1, 1]} : vector<16x128xf32> to vector<16x32xf32>
    %69 = vector.shape_cast %68 : vector<16x32xf32> to vector<2x8x32xf32>
    %70 = vector.extract_strided_slice %67 {offsets = [0, 32], sizes = [16, 32], strides = [1, 1]} : vector<16x128xf32> to vector<16x32xf32>
    %71 = vector.shape_cast %70 : vector<16x32xf32> to vector<2x8x32xf32>
    %72 = vector.extract_strided_slice %67 {offsets = [0, 64], sizes = [16, 32], strides = [1, 1]} : vector<16x128xf32> to vector<16x32xf32>
    %73 = vector.shape_cast %72 : vector<16x32xf32> to vector<2x8x32xf32>
    %74 = vector.shape_cast %71 : vector<2x8x32xf32> to vector<2x1x8x32xf32>
    %75 = vector.shape_cast %8 : vector<8x32xf32> to vector<1x8x1x32xf32>
    %76 = vector.broadcast %74 : vector<2x1x8x32xf32> to vector<2x8x8x32xf32>
    %77 = vector.broadcast %75 : vector<1x8x1x32xf32> to vector<2x8x8x32xf32>
    %78 = arith.mulf %76, %77 : vector<2x8x8x32xf32>
    %79 = vector.shape_cast %78 : vector<2x8x8x32xf32> to vector<2x64x32xf32>
    %80 = vector.shape_cast %73 : vector<2x8x32xf32> to vector<2x1x8x32xf32>
    %81 = vector.shape_cast %8 : vector<8x32xf32> to vector<1x8x1x32xf32>
    %82 = vector.broadcast %80 : vector<2x1x8x32xf32> to vector<2x8x8x32xf32>
    %83 = vector.broadcast %81 : vector<1x8x1x32xf32> to vector<2x8x8x32xf32>
    %84 = arith.mulf %82, %83 : vector<2x8x8x32xf32>
    %85 = vector.shape_cast %84 : vector<2x8x8x32xf32> to vector<2x64x32xf32>
    "tpu.trace_start"() <{level = 10 : i32, message = "bqd,bmd->bqm"}> : () -> ()
    %cst_63 = arith.constant dense<0.000000e+00> : vector<2x8x64xf32>
    %86 = tpu.matmul %69, %79, %cst_63 {dimension_numbers = #tpu.dot_dimension_numbers<[2], [2], [1], [1], [0, 0, 0, 1, 1, 1], [0], [0]>} : vector<2x8x32xf32>, vector<2x64x32xf32>, vector<2x8x64xf32> -> vector<2x8x64xf32>
    "tpu.trace_stop"() : () -> ()
    %cst_64 = arith.constant 5.000000e-01 : f32
    %87 = vector.broadcast %cst_64 : f32 to vector<2x8x64xf32>
    %88 = arith.mulf %86, %87 : vector<2x8x64xf32>
    %cst_65 = arith.constant 1.000000e+00 : f32
    %89 = vector.broadcast %cst_65 : f32 to vector<2x64xf32>
    %90 = arith.subf %5, %89 : vector<2x64xf32>
    %cst_66 = arith.constant 1.000000e+09 : f32
    %91 = vector.broadcast %cst_66 : f32 to vector<2x64xf32>
    %92 = arith.mulf %90, %91 : vector<2x64xf32>
    %93 = vector.shape_cast %92 : vector<2x64xf32> to vector<2x1x64xf32>
    %94 = vector.broadcast %93 : vector<2x1x64xf32> to vector<2x8x64xf32>
    %95 = arith.addf %88, %94 : vector<2x8x64xf32>
    %cst_67 = arith.constant dense<0xFF800000> : vector<2x8xf32>
    %96 = vector.multi_reduction <maximumf>, %95, %cst_67 [2] : vector<2x8x64xf32> to vector<2x8xf32>
    %97 = vector.shape_cast %96 : vector<2x8xf32> to vector<2x8x1xf32>
    %98 = vector.broadcast %97 : vector<2x8x1xf32> to vector<2x8x64xf32>
    %99 = arith.subf %95, %98 : vector<2x8x64xf32>
    %100 = math.exp %99 : vector<2x8x64xf32>
    %101 = vector.shape_cast %100 : vector<2x8x64xf32> to vector<16x64xf32>
    %cst_68 = arith.constant dense<0.000000e+00> : vector<16x8xf32>
    %102 = tpu.matmul %101, %9, %cst_68 {dimension_numbers = #tpu.dot_dimension_numbers<[1], [0], [0], [1], [0, 0, 1, 1], [], []>} : vector<16x64xf32>, vector<64x8xf32>, vector<16x8xf32> -> vector<16x8xf32>
    %103 = tpu.reciprocal %102 {approx = true} : vector<16x8xf32> -> vector<16x8xf32>
    %cst_69 = arith.constant dense<0.000000e+00> : vector<16x32xf32>
    %104 = tpu.matmul %103, %8, %cst_69 {dimension_numbers = #tpu.dot_dimension_numbers<[1], [0], [0], [1], [0, 0, 1, 1], [], []>} : vector<16x8xf32>, vector<8x32xf32>, vector<16x32xf32> -> vector<16x32xf32>
    %105 = vector.shape_cast %104 : vector<16x32xf32> to vector<2x8x32xf32>
    "tpu.trace_start"() <{level = 10 : i32, message = "bqm,bmd->bqd"}> : () -> ()
    %cst_70 = arith.constant dense<0.000000e+00> : vector<2x8x32xf32>
    %106 = tpu.matmul %100, %85, %cst_70 {dimension_numbers = #tpu.dot_dimension_numbers<[2], [1], [1], [2], [0, 0, 0, 1, 1, 2], [0], [0]>} : vector<2x8x64xf32>, vector<2x64x32xf32>, vector<2x8x32xf32> -> vector<2x8x32xf32>
    "tpu.trace_stop"() : () -> ()
    %107 = arith.mulf %106, %105 : vector<2x8x32xf32>
    %108 = vector.shape_cast %107 : vector<2x8x32xf32> to vector<16x32xf32>
    %109 = vector.extract_strided_slice %7 {offsets = [0, 96], sizes = [32, 32], strides = [1, 1]} : vector<32x128xf32> to vector<32x32xf32>
    %cst_71 = arith.constant dense<0.000000e+00> : vector<16x32xf32>
    %110 = tpu.matmul %108, %109, %cst_71 {dimension_numbers = #tpu.dot_dimension_numbers<[1], [0], [0], [1], [0, 0, 1, 1], [], []>} : vector<16x32xf32>, vector<32x32xf32>, vector<16x32xf32> -> vector<16x32xf32>
    %111 = vector.extract_strided_slice %14 {offsets = [0, 96], sizes = [1, 32], strides = [1, 1]} : vector<1x128xf32> to vector<1x32xf32>
    %112 = vector.broadcast %111 : vector<1x32xf32> to vector<16x32xf32>
    %113 = arith.addf %110, %112 : vector<16x32xf32>
    %114 = vector.shape_cast %113 : vector<16x32xf32> to vector<2x8x32xf32>
    %115 = vector.shape_cast %6 : vector<2x8xf32> to vector<2x8x1xf32>
    %116 = vector.broadcast %115 : vector<2x8x1xf32> to vector<2x8x32xf32>
    %117 = arith.mulf %114, %116 : vector<2x8x32xf32>
    %cst_72 = arith.constant dense<0xFF800000> : vector<2x32xf32>
    %118 = vector.multi_reduction <maximumf>, %117, %cst_72 [1] : vector<2x8x32xf32> to vector<2x32xf32>
    %cst_73 = arith.constant dense<0.000000e+00> : vector<2xf32>
    %119 = vector.multi_reduction <add>, %6, %cst_73 [1] : vector<2x8xf32> to vector<2xf32>
    %120 = vector.shape_cast %119 : vector<2xf32> to vector<2x1xf32>
    %121 = tpu.reciprocal %120 {approx = true} : vector<2x1xf32> -> vector<2x1xf32>
    %cst_74 = arith.constant dense<0.000000e+00> : vector<2x32xf32>
    %122 = vector.multi_reduction <add>, %117, %cst_74 [1] : vector<2x8x32xf32> to vector<2x32xf32>
    %123 = vector.broadcast %121 : vector<2x1xf32> to vector<2x32xf32>
    %124 = arith.mulf %122, %123 : vector<2x32xf32>
    %125 = vector.broadcast %115 : vector<2x8x1xf32> to vector<2x8x32xf32>
    %126 = arith.mulf %2, %125 : vector<2x8x32xf32>
    %cst_75 = arith.constant dense<0xFF800000> : vector<2x32xf32>
    %127 = vector.multi_reduction <maximumf>, %126, %cst_75 [1] : vector<2x8x32xf32> to vector<2x32xf32>
    %c0_76 = arith.constant 0 : index
    %c0_77 = arith.constant 0 : index
    %128 = vector.load %arg4[%c0_76, %c0_77] : memref<640x32xbf16, #tpu.memory_space<vmem>>, vector<32x32xbf16>
    %129 = arith.truncf %4 : vector<2x32xf32> to vector<2x32xbf16>
    %cst_78 = arith.constant dense<0.000000e+00> : vector<2x32xf32>
    %130 = tpu.matmul %129, %128, %cst_78 {dimension_numbers = #tpu.dot_dimension_numbers<[1], [0], [0], [1], [0, 0, 1, 1], [], []>} : vector<2x32xbf16>, vector<32x32xbf16>, vector<2x32xf32> -> vector<2x32xf32>
    %c32_79 = arith.constant 32 : index
    %c0_80 = arith.constant 0 : index
    %131 = vector.load %arg4[%c32_79, %c0_80] : memref<640x32xbf16, #tpu.memory_space<vmem>>, vector<32x32xbf16>
    %132 = arith.truncf %118 : vector<2x32xf32> to vector<2x32xbf16>
    %cst_81 = arith.constant dense<0.000000e+00> : vector<2x32xf32>
    %133 = tpu.matmul %132, %131, %cst_81 {dimension_numbers = #tpu.dot_dimension_numbers<[1], [0], [0], [1], [0, 0, 1, 1], [], []>} : vector<2x32xbf16>, vector<32x32xbf16>, vector<2x32xf32> -> vector<2x32xf32>
    %134 = arith.addf %130, %133 : vector<2x32xf32>
    %c64 = arith.constant 64 : index
    %c0_82 = arith.constant 0 : index
    %135 = vector.load %arg4[%c64, %c0_82] : memref<640x32xbf16, #tpu.memory_space<vmem>>, vector<32x32xbf16>
    %136 = arith.truncf %124 : vector<2x32xf32> to vector<2x32xbf16>
    %cst_83 = arith.constant dense<0.000000e+00> : vector<2x32xf32>
    %137 = tpu.matmul %136, %135, %cst_83 {dimension_numbers = #tpu.dot_dimension_numbers<[1], [0], [0], [1], [0, 0, 1, 1], [], []>} : vector<2x32xbf16>, vector<32x32xbf16>, vector<2x32xf32> -> vector<2x32xf32>
    %138 = arith.addf %134, %137 : vector<2x32xf32>
    %c96 = arith.constant 96 : index
    %c0_84 = arith.constant 0 : index
    %139 = vector.load %arg4[%c96, %c0_84] : memref<640x32xbf16, #tpu.memory_space<vmem>>, vector<32x32xbf16>
    %140 = arith.truncf %127 : vector<2x32xf32> to vector<2x32xbf16>
    %cst_85 = arith.constant dense<0.000000e+00> : vector<2x32xf32>
    %141 = tpu.matmul %140, %139, %cst_85 {dimension_numbers = #tpu.dot_dimension_numbers<[1], [0], [0], [1], [0, 0, 1, 1], [], []>} : vector<2x32xbf16>, vector<32x32xbf16>, vector<2x32xf32> -> vector<2x32xf32>
    %142 = arith.addf %138, %141 : vector<2x32xf32>
    %c128 = arith.constant 128 : index
    %c0_86 = arith.constant 0 : index
    %143 = vector.load %arg4[%c128, %c0_86] : memref<640x32xbf16, #tpu.memory_space<vmem>>, vector<512x32xbf16>
    %144 = arith.truncf %63 : vector<2x512xf32> to vector<2x512xbf16>
    %cst_87 = arith.constant dense<0.000000e+00> : vector<2x32xf32>
    %145 = tpu.matmul %144, %143, %cst_87 {dimension_numbers = #tpu.dot_dimension_numbers<[1], [0], [0], [1], [0, 0, 1, 1], [], []>} : vector<2x512xbf16>, vector<512x32xbf16>, vector<2x32xf32> -> vector<2x32xf32>
    %146 = arith.addf %142, %145 : vector<2x32xf32>
    %147 = vector.broadcast %15 : vector<1x32xf32> to vector<2x32xf32>
    %148 = arith.addf %146, %147 : vector<2x32xf32>
    %cst_88 = arith.constant dense<0.000000e+00> : vector<2xf32>
    %149 = vector.multi_reduction <add>, %148, %cst_88 [1] : vector<2x32xf32> to vector<2xf32>
    %150 = vector.shape_cast %149 : vector<2xf32> to vector<2x1xf32>
    %cst_89 = arith.constant 3.200000e+01 : f32
    %151 = vector.broadcast %cst_89 : f32 to vector<2x1xf32>
    %152 = arith.divf %150, %151 : vector<2x1xf32>
    %153 = vector.broadcast %152 : vector<2x1xf32> to vector<2x32xf32>
    %154 = arith.subf %148, %153 : vector<2x32xf32>
    %155 = arith.mulf %154, %154 : vector<2x32xf32>
    %cst_90 = arith.constant dense<0.000000e+00> : vector<2xf32>
    %156 = vector.multi_reduction <add>, %155, %cst_90 [1] : vector<2x32xf32> to vector<2xf32>
    %157 = vector.shape_cast %156 : vector<2xf32> to vector<2x1xf32>
    %cst_91 = arith.constant 3.200000e+01 : f32
    %158 = vector.broadcast %cst_91 : f32 to vector<2x1xf32>
    %159 = arith.divf %157, %158 : vector<2x1xf32>
    %160 = vector.broadcast %152 : vector<2x1xf32> to vector<2x32xf32>
    %161 = arith.subf %148, %160 : vector<2x32xf32>
    %cst_92 = arith.constant 9.99999974E-6 : f32
    %162 = vector.broadcast %cst_92 : f32 to vector<2x1xf32>
    %163 = arith.addf %159, %162 : vector<2x1xf32>
    %164 = math.rsqrt %163 : vector<2x1xf32>
    %165 = vector.broadcast %164 : vector<2x1xf32> to vector<2x32xf32>
    %166 = arith.mulf %161, %165 : vector<2x32xf32>
    %167 = vector.broadcast %16 : vector<1x32xf32> to vector<2x32xf32>
    %168 = arith.mulf %166, %167 : vector<2x32xf32>
    %169 = vector.broadcast %17 : vector<1x32xf32> to vector<2x32xf32>
    %170 = arith.addf %168, %169 : vector<2x32xf32>
    %cst_93 = arith.constant 0.000000e+00 : f32
    %171 = vector.broadcast %cst_93 : f32 to vector<2x32xf32>
    %172 = arith.maximumf %170, %171 : vector<2x32xf32>
    %c0_94 = arith.constant 0 : index
    %c0_95 = arith.constant 0 : index
    %173 = vector.load %arg5[%c0_94, %c0_95] : memref<32x512xbf16, #tpu.memory_space<vmem>>, vector<32x512xbf16>
    %174 = arith.truncf %172 : vector<2x32xf32> to vector<2x32xbf16>
    %cst_96 = arith.constant dense<0.000000e+00> : vector<2x512xf32>
    %175 = tpu.matmul %174, %173, %cst_96 {dimension_numbers = #tpu.dot_dimension_numbers<[1], [0], [0], [1], [0, 0, 1, 1], [], []>} : vector<2x32xbf16>, vector<32x512xbf16>, vector<2x512xf32> -> vector<2x512xf32>
    %176 = vector.broadcast %11 : vector<1x512xf32> to vector<2x512xf32>
    %177 = arith.addf %175, %176 : vector<2x512xf32>
    %cst_97 = arith.constant dense<0.000000e+00> : vector<2xf32>
    %178 = vector.multi_reduction <add>, %177, %cst_97 [1] : vector<2x512xf32> to vector<2xf32>
    %179 = vector.shape_cast %178 : vector<2xf32> to vector<2x1xf32>
    %cst_98 = arith.constant 5.120000e+02 : f32
    %180 = vector.broadcast %cst_98 : f32 to vector<2x1xf32>
    %181 = arith.divf %179, %180 : vector<2x1xf32>
    %182 = vector.broadcast %181 : vector<2x1xf32> to vector<2x512xf32>
    %183 = arith.subf %177, %182 : vector<2x512xf32>
    %184 = arith.mulf %183, %183 : vector<2x512xf32>
    %cst_99 = arith.constant dense<0.000000e+00> : vector<2xf32>
    %185 = vector.multi_reduction <add>, %184, %cst_99 [1] : vector<2x512xf32> to vector<2xf32>
    %186 = vector.shape_cast %185 : vector<2xf32> to vector<2x1xf32>
    %cst_100 = arith.constant 5.120000e+02 : f32
    %187 = vector.broadcast %cst_100 : f32 to vector<2x1xf32>
    %188 = arith.divf %186, %187 : vector<2x1xf32>
    %189 = vector.broadcast %181 : vector<2x1xf32> to vector<2x512xf32>
    %190 = arith.subf %177, %189 : vector<2x512xf32>
    %cst_101 = arith.constant 9.99999974E-6 : f32
    %191 = vector.broadcast %cst_101 : f32 to vector<2x1xf32>
    %192 = arith.addf %188, %191 : vector<2x1xf32>
    %193 = math.rsqrt %192 : vector<2x1xf32>
    %194 = vector.broadcast %193 : vector<2x1xf32> to vector<2x512xf32>
    %195 = arith.mulf %190, %194 : vector<2x512xf32>
    %196 = vector.broadcast %12 : vector<1x512xf32> to vector<2x512xf32>
    %197 = arith.mulf %195, %196 : vector<2x512xf32>
    %198 = vector.broadcast %13 : vector<1x512xf32> to vector<2x512xf32>
    %199 = arith.addf %197, %198 : vector<2x512xf32>
    %cst_102 = arith.constant 0.000000e+00 : f32
    %200 = vector.broadcast %cst_102 : f32 to vector<2x512xf32>
    %201 = arith.maximumf %199, %200 : vector<2x512xf32>
    %c0_103 = arith.constant 0 : index
    %c0_104 = arith.constant 0 : index
    %202 = vector.load %arg6[%c0_103, %c0_104] : memref<512x128xbf16, #tpu.memory_space<vmem>>, vector<512x128xbf16>
    %203 = arith.truncf %201 : vector<2x512xf32> to vector<2x512xbf16>
    %cst_105 = arith.constant dense<0.000000e+00> : vector<2x128xf32>
    %204 = tpu.matmul %203, %202, %cst_105 {dimension_numbers = #tpu.dot_dimension_numbers<[1], [0], [0], [1], [0, 0, 1, 1], [], []>} : vector<2x512xbf16>, vector<512x128xbf16>, vector<2x128xf32> -> vector<2x128xf32>
    %205 = vector.broadcast %18 : vector<1x128xf32> to vector<2x128xf32>
    %206 = arith.addf %204, %205 : vector<2x128xf32>
    %c0_106 = arith.constant 0 : index
    %c0_107 = arith.constant 0 : index
    %207 = vector.load %arg8[%c0_106, %c0_107] : memref<2x128xf32, #tpu.memory_space<vmem>>, vector<2x128xf32>
    tpu.vector_store %arg8[%c0_106, %c0_107], %206 {strides = array<i32>} : memref<2x128xf32, #tpu.memory_space<vmem>>, vector<2x128xf32>,
    return
  }
}

</mosaic_0001>

<bundles_post_ra>
// kernel: tile.9
= control target key start
LH: loop header
LB: loop body
LE: loop exit
PB: predicated region body
PF: predicated region fallthrough
CT: control target
= control target key end

     0   :  { %s7_s6 = smov 3  ;;  %s21_s9 = smov 3  ;;  %vm4_vm0 = vcmask 64512   ;;  %vm11_vm1 = vcmask 523712   ;;  %vm18_vm2 = vcmask 458112   ;;  %vm25_vm3 = vcmask 392512   ;;  %s119_s0 = inlined_call_operand.vmem [shape: f32[2,8,8], index: 0, kind: input, shape index: {}]   ;;  %s120_s1 = inlined_call_operand.vmem [shape: f32[2,64], index: 1, kind: output, shape index: {}]  }
   0x1   :  { %v61_v0 = vld [vmem:[%s119_s0 + $0x7] ss:$8 sm:%s7_s6]   ;;  %s75_s10 = smov 56   ;;  %v63_v1 = vld [vmem:[%s119_s0 + $0x5] ss:$8 sm:%s21_s9]   ;;  %s76_s13 = smov 40  }
   0x2   :  { %9 = vrot.lane.b32.xlu0 %v61_v0, %s75_s10  ;;  %23 = vrot.lane.b32.xlu1 %v63_v1, %s76_s13  ;;  %s14_s14 = smov 3  ;;  %s28_s15 = smov 3  ;;  %vm32_vm4 = vcmask 326912   ;;  %vm39_vm5 = vcmask 261312   ;;  %vm46_vm6 = vcmask 195712   ;;  %vm53_vm7 = vcmask 130112  }
   0x3   :  { %s35_s16 = smov 3  ;;  %v62_v3 = vld [vmem:[%s119_s0 + $0x6] ss:$8 sm:%s14_s14]   ;;  %s77_s21 = smov 24   ;;  %v64_v4 = vld [vmem:[%s119_s0 + $0x4] ss:$8 sm:%s28_s15]  }
   0x4   :  { %v65_v2 = vld [vmem:[%s119_s0 + $0x3] ss:$8 sm:%s35_s16]   ;;  %s42_s24 = smov 3  ;;  %s78_s25 = smov 48  }
   0x5   :  { %37 = vrot.lane.b32.xlu2 %v65_v2, %s77_s21  ;;  %s79_s26 = smov 32   ;;  %s49_s27 = smov 3  ;;  %v66_v5 = vld [vmem:[%s119_s0 + $0x2] ss:$8 sm:%s42_s24]  }
   0x6   :  { %v67_v6 = vld [vmem:[%s119_s0 + $0x1] ss:$8 sm:%s49_s27]   ;;  %s80_s3 = smov 16   ;;  %s81_s4 = smov 8  }
   0x7   :  { %s2_s5 = smov 3 }
   0x8   :  { %v3_v7 = vld [vmem:[%s119_s0] ss:$8 sm:%s2_s5]  }
   0x9   :  { %5 = vst.msk [vmem:[#allocation0] sm:$0x3] %vm4_vm0, %v3_v7  }
   0xa   :  { %16 = vrot.lane.b32.xlu0 %v62_v3, %s78_s25  ;;  %30 = vrot.lane.b32.xlu1 %v64_v4, %s79_s26 }
   0xd   :  { %44 = vrot.lane.b32.xlu2 %v66_v5, %s80_s3 }
  0x12   :  { %51 = vrot.lane.b32.xlu0 %v67_v6, %s81_s4 }
  0x5f   :  { %v38_v8 = vpop.permute.xlu2 %37  }
  0x67   :  { %v45_v9 = vpop.permute.xlu2 %44  }
  0x74   :  { %v10_v10 = vpop.permute.xlu0 %9   ;;  %v24_v11 = vpop.permute.xlu1 %23  }
  0x75   :  { %12 = vst.msk [vmem:[#allocation0] sm:$0x3] %vm11_vm1, %v10_v10  }
  0x7c   :  { %v17_v12 = vpop.permute.xlu0 %16   ;;  %v31_v13 = vpop.permute.xlu1 %30  }
  0x7d   :  { %19 = vst.msk [vmem:[#allocation0] sm:$0x3] %vm18_vm2, %v17_v12  }
  0x7e   :  { %26 = vst.msk [vmem:[#allocation0] sm:$0x3] %vm25_vm3, %v24_v11  }
  0x7f   :  { %33 = vst.msk [vmem:[#allocation0] sm:$0x3] %vm32_vm4, %v31_v13  }
  0x80   :  { %40 = vst.msk [vmem:[#allocation0] sm:$0x3] %vm39_vm5, %v38_v8  }
  0x81   :  { %47 = vst.msk [vmem:[#allocation0] sm:$0x3] %vm46_vm6, %v45_v9  }
  0x84   :  { %v52_v14 = vpop.permute.xlu0 %51  }
  0x85   :  { %54 = vst.msk [vmem:[#allocation0] sm:$0x3] %vm53_vm7, %v52_v14  }
  0x8c   :  { %v57_v15 = vld [vmem:[#allocation0] sm:$0x3] }
  0x8d   :  { %60 = vst [vmem:[%s120_s1] sm:$0x3] %v57_v15 }

// kernel: news_classifier_forward.1
= control target key start
LH: loop header
LB: loop body
LE: loop exit
PB: predicated region body
PF: predicated region fallthrough
CT: control target
= control target key end

     0   :  { %13 = vsyncpa [#allocation4], 0  ;;  %s4120_s0 = inlined_call_operand.vmem [shape: f32[2,8,64], index: 0, kind: input, shape index: {}]   ;;  %s4121_s1 = inlined_call_operand.vmem [shape: f32[2,96], index: 1, kind: input, shape index: {}]   ;;  %s4122_s2 = inlined_call_operand.vmem [shape: f32[104,128], index: 2, kind: input, shape index: {}]   ;;  %s4123_s3 = inlined_call_operand.vmem [shape: bf16[5,32,512], index: 3, kind: input, shape index: {}]   ;;  %s4124_s4 = inlined_call_operand.vmem [shape: bf16[640,32], index: 4, kind: input, shape index: {}]   ;;  %s4125_s5 = inlined_call_operand.vmem [shape: bf16[32,512], index: 5, kind: input, shape index: {}]   ;;  %s4126_s6 = inlined_call_operand.hbm [shape: bf16[512,128], index: 6, kind: input, shape index: {}]   ;;  %s4127_s7 = inlined_call_operand.vmem [shape: f32[9,512], index: 7, kind: input, shape index: {}]   ;;  %s4128_s8 = inlined_call_operand.hbm [shape: f32[2,128], index: 8, kind: output, shape index: {}]  }
   0x1   :  { %14 = vsyncpa [#allocation5], 0  ;;  %s31_s29 = sshll.u32 %s4126_s6, 4  ;;  %s3191_s30 = smov [#allocation3]   ;;  %s32_s29 = int_to_ptr.hbm [resolvable:$true] %s31_s29 }
   0x2   :  { %s33_s9 = sshll.u32 %s3191_s30, 4  ;;  %s3192_s10 = smov 64   ;;  %s34_s9 = int_to_ptr.vmem [resolvable:$true] %s33_s9 }
   0x3   :  { %s3193_s11 = smov 4  }
   0x4   :  { %39 = dma.hbm_to_vmem [thread:$0]  %s32_s29, 4096, %s34_s9, [#allocation4], %s3192_s10, %s3192_s10, %s3193_s11  }
   0x5   :  { %3187 = dma.done.wait [#allocation4], 4096  }
   0x6   :  { %3188 = vsyncadd [#allocation4], 4294963200  ;;  %vm75_vm0 = vcmask 261120   ;;  %vm77_vm1 = vcmask 257024   ;;  %v3194_v0 = vmov 0.0   ;;  %v3267_v6 = vld [vmem:[%s4120_s0] sm:$0xff] }
   0x7   :  { %76 = vst.msk [vmem:[#allocation2] sm:$0xff] %vm75_vm0, %v3194_v0  ;;  %v2397_v1 = vld [vmem:[%s4123_s3 + $0x60] sm:$0xf]  ;;  %v2954_v2 = vld [vmem:[%s4123_s3 + $0x6c] sm:$0xf0]  ;;  %v3272_v7 = vld [vmem:[%s4120_s0 + $0x8] sm:$0xff] }
   0x8   :  { %78 = vst.msk [vmem:[#allocation2 + $0x8] sm:$0xf] %vm77_vm1, %v3194_v0  ;;  %v2381_v3 = vld [vmem:[%s4123_s3 + $0x40] sm:$0xf]  ;;  %v2398_v4 = vor.u32 %v2954_v2, %v2397_v1  ;;  %v2950_v5 = vld [vmem:[%s4123_s3 + $0x4c] sm:$0xf0] }
   0x9   :  { %79 = vst.msk [vmem:[#allocation2 + $0x10] sm:$0xff] %vm75_vm0, %v3194_v0  ;;  %v2433_v8 = vld [vmem:[%s4123_s3 + $0x20] sm:$0xf]  ;;  %v2946_v9 = vld [vmem:[%s4123_s3 + $0x2c] sm:$0xf0]  ;;  %v2382_v10 = vor.u32 %v2950_v5, %v2381_v3  ;;  %v3341_v41 = vld [vmem:[%s4122_s2 + $0x18] sm:$0xff] }
   0xa   :  { %80 = vst.msk [vmem:[#allocation2 + $0x18] sm:$0xf] %vm77_vm1, %v3194_v0  ;;  %155 = vmatpush.bf16.msra.mxu0 %v2398_v4  ;;  %v2434_v11 = vor.u32 %v2946_v9, %v2433_v8  ;;  %v2417_v12 = vld [vmem:[%s4123_s3] sm:$0xf]  ;;  %v2942_v13 = vld [vmem:[%s4123_s3 + $0xc] sm:$0xf0] }
   0xb   :  { %81 = vst.msk [vmem:[#allocation2 + $0x2] sm:$0xff] %vm75_vm0, %v3267_v6  ;;  %v2477_v14 = vld [vmem:[%s4123_s3 + $0xa0] sm:$0xf]  ;;  %v2962_v15 = vld [vmem:[%s4123_s3 + $0xac] sm:$0xf0]  ;;  %v2418_v16 = vor.u32 %v2942_v13, %v2417_v12  ;;  %v3353_v45 = vld [vmem:[%s4122_s2 + $0x8] sm:$0xff] }
   0xc   :  { %82 = vst.msk [vmem:[#allocation2 + $0x12] sm:$0xff] %vm75_vm0, %v3272_v7  ;;  %v2478_v19 = vor.u32 %v2962_v15, %v2477_v14  ;;  %v2461_v21 = vld [vmem:[%s4123_s3 + $0x80] sm:$0xf]  ;;  %v2958_v22 = vld [vmem:[%s4123_s3 + $0x8c] sm:$0xf0]  ;;  %s3195_s19 = smov 32  }
   0xd   :  { %v2462_v23 = vor.u32 %v2958_v22, %v2461_v21  ;;  %v2521_v26 = vld [vmem:[%s4123_s3 + $0xe0] sm:$0xf]  ;;  %v2970_v27 = vld [vmem:[%s4123_s3 + $0xec] sm:$0xf0]  ;;  %v2405_v22 = vld [vmem:[%s4123_s3 + $0x68] sm:$0xf] }
   0xe   :  { %156 = vmatpush.bf16.msra.mxu0 %v2382_v10  ;;  %v2522_v29 = vor.u32 %v2970_v27, %v2521_v26  ;;  %v2505_v30 = vld [vmem:[%s4123_s3 + $0xc0] sm:$0xf]  ;;  %v2966_v31 = vld [vmem:[%s4123_s3 + $0xcc] sm:$0xf0]  ;;  %v2383_v26 = vld [vmem:[%s4123_s3 + $0x50] sm:$0xf0] }
   0xf   :  { %v2506_v32 = vor.u32 %v2966_v31, %v2505_v30  ;;  %v2565_v35 = vld [vmem:[%s4123_s3 + $0x120] sm:$0xf]  ;;  %v2978_v36 = vld [vmem:[%s4123_s3 + $0x12c] sm:$0xf0]  ;;  %v2389_v31 = vld [vmem:[%s4123_s3 + $0x48] sm:$0xf] }
  0x10   :  { %v2566_v38 = vor.u32 %v2978_v36, %v2565_v35  ;;  %v2549_v39 = vld [vmem:[%s4123_s3 + $0x100] sm:$0xf]  ;;  %v2974_v40 = vld [vmem:[%s4123_s3 + $0x10c] sm:$0xf0]  ;;  %s3196_s0 = smov 96   ;;  %vm1321_vm2 = vcmask 1041409  }
  0x11   :  { %v3346_v42 = vld [vmem:[%s4122_s2 + $0x10] sm:$0xff]  ;;  %v2550_v43 = vor.u32 %v2974_v40, %v2549_v39  ;;  %v3358_v46 = vld [vmem:[%s4122_s2] sm:$0xff]  ;;  %vm1001_vm3 = vcmask 523264   ;;  %vm1045_vm4 = vcmask 64512   ;;  %vm1291_vm5 = vcmask 523520   ;;  %s3199_s20 = smov [#allocation6]  }
  0x12   :  { %254 = vmatpush.bf16.msrb.mxu0 %v2434_v11  ;;  %v94_v17 = vld [vmem:[#allocation2 + $0x1] sm:$0xff]  ;;  %v3109_v44 = vpack.i.bf16 %v3346_v42, %v3341_v41  ;;  %v3114_v48 = vpack.i.bf16 %v3358_v46, %v3353_v45  ;;  %v2435_v39 = vld [vmem:[%s4123_s3 + $0x30] sm:$0xf0]  ;;  %vm1264_vm6 = vcmask 58368   ;;  %vm1811_vm7 = vcmask 254976   ;;  %s2358_s23 = sshll.u32 %s4128_s8, 4  ;;  %s2359_s23 = int_to_ptr.hbm [resolvable:$true] %s2358_s23 }
  0x13   :  { %v95_v18 = vld [vmem:[#allocation2 + $0x11] sm:$0xff]  ;;  %v83_v24 = vld [vmem:[#allocation2] sm:$0xff]  ;;  %vm1957_vm12 = vcmask 1041408  }
  0x14   :  { %v3296_v20 = vpack.c.bf16 %v95_v18, %v94_v17  ;;  %v84_v25 = vld [vmem:[#allocation2 + $0x10] sm:$0xff]  ;;  %v304_v33 = vld [vmem:[#allocation2 + $0x2] sm:$0xff] }
  0x15   :  { %v3312_v28 = vpack.c.bf16 %v84_v25, %v83_v24  ;;  %v305_v34 = vld [vmem:[#allocation2 + $0x12] sm:$0xff]  ;;  %v3363_v47 = vld [vmem:[%s4122_s2 + $0x20] sm:$0xff] }
  0x16   :  { %255 = vmatpush.bf16.msrb.mxu0 %v2418_v16  ;;  %v3328_v37 = vpack.c.bf16 %v305_v34, %v304_v33  ;;  %v770_v49 = vrot.slane %v3363_v47, 7  ;;  %v768_v50 = vrot.slane %v3363_v47, 5  ;;  %v423_v53 = vld [vmem:[#allocation2 + $0x3] sm:$0xff]  ;;  %v424_v54 = vld [vmem:[#allocation2 + $0x13] sm:$0xff]  ;;  %v769_v56 = vrot.slane %v3363_v47, 6 }
  0x17   :  { %2411 = vmatmul.msk.bf16.vlgmr.msra.gmra.mxu0 %vm75_vm0, %v3296_v20  ;;  %v3377_v55 = vpack.c.bf16 %v424_v54, %v423_v53  ;;  %v767_v57 = vrot.slane %v3363_v47, 4  ;;  %v771_v60 = vperm.slane %v3363_v47, 0  ;;  %v764_v61 = vrot.slane %v3363_v47, 1  ;;  %v542_v63 = vld [vmem:[#allocation2 + $0x4] sm:$0xff]  ;;  %v543_v0 = vld [vmem:[#allocation2 + $0x14] sm:$0xff] }
  0x18   :  { %v3369_v51 = vperm.slane %v770_v49, 0  ;;  %v3371_v52 = vperm.slane %v768_v50, 0  ;;  %v3384_v58 = vperm.slane %v769_v56, 0  ;;  %v766_v62 = vrot.slane %v3363_v47, 3  ;;  %v2952_v18 = vld [vmem:[%s4123_s3 + $0x64] sm:$0xf] }
  0x19   :  { %v3386_v59 = vperm.slane %v767_v57, 0  ;;  %v3398_v1 = vperm.slane %v764_v61, 0  ;;  %v3402_v3 = vpack.c.bf16 %v543_v0, %v542_v63  ;;  %v765_v4 = vrot.slane %v3363_v47, 2  ;;  %v2948_v25 = vld [vmem:[%s4123_s3 + $0x44] sm:$0xf] }
  0x1a   :  { %365 = vmatpush.bf16.msra.mxu0 %v2478_v19  ;;  %793 = vrot.lane.b32.xlu0 %v3369_v51, %s3195_s19  ;;  %v3400_v2 = vperm.slane %v766_v62, 0  ;;  %v2399_v19 = vld [vmem:[%s4123_s3 + $0x70] sm:$0xf0]  ;;  %v3454_v36 = vld [vmem:[%s4127_s7] ss:$8 sm:$0xf] }
  0x1b   :  { %789 = vrot.lane.b32.xlu1 %v3371_v52, %s3195_s19  ;;  %v3414_v5 = vperm.slane %v765_v4, 0  ;;  %v2402_v21 = vor.u32 %v2952_v18, %v2399_v19  ;;  %v662_v40 = vperm.slane %v3454_v36, 0  ;;  %v2441_v49 = vld [vmem:[%s4123_s3 + $0x28] sm:$0xf]  ;;  %v2947_v50 = vld [vmem:[%s4123_s3 + $0x34] sm:$0xf0] }
  0x1c   :  { %785 = vrot.lane.b32.xlu2 %v3400_v2, %s3195_s19  ;;  %v2940_v53 = vld [vmem:[%s4123_s3 + $0x4] sm:$0xf]  ;;  %v2442_v56 = vor.u32 %v2947_v50, %v2441_v49  ;;  %v2419_v57 = vld [vmem:[%s4123_s3 + $0x10] sm:$0xf0]  ;;  %v2425_v61 = vld [vmem:[%s4123_s3 + $0x8] sm:$0xf] }
  0x1d   :  { %169 = vmatpush.bf16.msra.mxu1 %v2402_v21  ;;  %v2943_v62 = vld [vmem:[%s4123_s3 + $0x14] sm:$0xf0]  ;;  %v2422_v0 = vor.u32 %v2940_v53, %v2419_v57  ;;  %v2960_v19 = vld [vmem:[%s4123_s3 + $0xa4] sm:$0xf]  ;;  %v2479_v21 = vld [vmem:[%s4123_s3 + $0xb0] sm:$0xf0] }
  0x1e   :  { %366 = vmatpush.bf16.msra.mxu0 %v2462_v23  ;;  %v2955_v23 = vld [vmem:[%s4123_s3 + $0x74] sm:$0xf0]  ;;  %v2426_v4 = vor.u32 %v2943_v62, %v2425_v61 }
  0x1f   :  { %v2406_v24 = vor.u32 %v2955_v23, %v2405_v22  ;;  %v3494_v22 = vld [vmem:[%s4127_s7 + $0x4] ss:$0 sm:$0xff]  ;;  %v2482_v23 = vor.u32 %v2960_v19, %v2479_v21  ;;  %v2971_v21 = vld [vmem:[%s4123_s3 + $0xf4] sm:$0xf0] }
  0x21   :  { %183 = vmatpush.bf16.msra.mxu2 %v2406_v24 }
  0x22   :  { %791 = vrot.lane.b32.xlu0 %v3384_v58, %s3195_s19 }
  0x23   :  { %787 = vrot.lane.b32.xlu1 %v3386_v59, %s3195_s19 }
  0x24   :  { %783 = vrot.lane.b32.xlu2 %v3414_v5, %s3195_s19 }
  0x27   :  { %2447 = vmatmul.msk.bf16.vlgmr.msrb.gmra.mxu0 %vm75_vm0, %v3312_v28 }
  0x28   :  { %484 = vmatpush.bf16.msrb.mxu0 %v2522_v29  ;;  %v2386_v29 = vor.u32 %v2948_v25, %v2383_v26  ;;  %v2485_v25 = vld [vmem:[%s4123_s3 + $0xa8] sm:$0xf]  ;;  %v2963_v26 = vld [vmem:[%s4123_s3 + $0xb4] sm:$0xf0] }
  0x2a   :  { %781 = vrot.lane.b32.xlu0 %v3398_v1, %s3195_s19  ;;  %170 = vmatpush.bf16.msra.mxu1 %v2386_v29  ;;  %v2486_v29 = vor.u32 %v2963_v26, %v2485_v25  ;;  %v2507_v25 = vld [vmem:[%s4123_s3 + $0xd0] sm:$0xf0] }
  0x2b   :  { %779 = vrot.lane.b32.xlu1 %v771_v60, %s3195_s19 }
  0x2c   :  { %485 = vmatpush.bf16.msrb.mxu0 %v2506_v32  ;;  %v2951_v32 = vld [vmem:[%s4123_s3 + $0x54] sm:$0xf0] }
  0x2d   :  { %v2390_v33 = vor.u32 %v2951_v32, %v2389_v31  ;;  %2412 = vmatmul.msk.bf16.vlgmr.msra.gmra.mxu1 %vm75_vm0, %v3296_v20  ;;  %v2463_v31 = vld [vmem:[%s4123_s3 + $0x90] sm:$0xf0]  ;;  %v2469_v32 = vld [vmem:[%s4123_s3 + $0x88] sm:$0xf] }
  0x2f   :  { %184 = vmatpush.bf16.msra.mxu2 %v2390_v33 }
  0x32   :  { %2413 = vmatmul.msk.bf16.vlgmr.msra.gmra.mxu2 %vm75_vm0, %v3296_v20 }
  0x33   :  { %282 = vmatpush.bf16.msrb.mxu2 %v2442_v56 }
  0x37   :  { %2491 = vmatmul.msk.bf16.vlgmr.msra.gmra.mxu0 %vm75_vm0, %v3328_v37  ;;  %283 = vmatpush.bf16.msrb.mxu2 %v2426_v4 }
  0x38   :  { %603 = vmatpush.bf16.msra.mxu0 %v2566_v38  ;;  %v2944_v38 = vld [vmem:[%s4123_s3 + $0x24] sm:$0xf] }
  0x3b   :  { %393 = vmatpush.bf16.msra.mxu2 %v2486_v29 }
  0x3c   :  { %604 = vmatpush.bf16.msra.mxu0 %v2550_v43  ;;  %v2438_v43 = vor.u32 %v2944_v38, %v2435_v39 }
  0x3e   :  { %268 = vmatpush.bf16.msrb.mxu1 %v2438_v43 }
  0x42   :  { %269 = vmatpush.bf16.msrb.mxu1 %v2422_v0  ;;  %2449 = vmatmul.msk.bf16.vlgmr.msrb.gmra.mxu2 %vm75_vm0, %v3312_v28 }
  0x45   :  { %2448 = vmatmul.msk.bf16.vlgmr.msrb.gmra.mxu1 %vm75_vm0, %v3312_v28 }
  0x46   :  { %379 = vmatpush.bf16.msra.mxu1 %v2482_v23 }
  0x47   :  { %2535 = vmatmul.msk.bf16.vlgmr.msrb.gmra.mxu0 %vm75_vm0, %v3377_v55 }
  0x48   :  { %752 = vmatpush.msrb.mxu0 %v3341_v41 }
  0x4a   :  { %753 = vmatpush.msrb.mxu0 %v3346_v42 }
  0x4c   :  { %754 = vmatpush.msrb.mxu0 %v3353_v45 }
  0x4e   :  { %755 = vmatpush.msrb.mxu0 %v3358_v46 }
  0x57   :  { %2579 = vmatmul.msk.bf16.vlgmr.msra.gmra.mxu0 %vm75_vm0, %v3402_v3 }
  0x58   :  { %1067 = vmatpush.msra.mxu0 %v3363_v47 }
  0x67   :  { %2583 = vmatmul.msk.f32.vlgmr.msrb.gmra.mxu0 %vm75_vm0, %v3267_v6 }
  0x6f   :  { %2584 = vmatmul.msk.f32.gmra.mxu0 %vm75_vm0, %v3272_v7 }
  0x94   :  { %v158_v8 = vpop.f32.mrf.mxu0 }
  0x9c   :  { %v160_v9 = vpop.f32.mrf.mxu0 }
  0xa4   :  { %v257_v10 = vpop.f32.mrf.mxu0 }
  0xa5   :  { %v258_v11 = vadd.f32 %v257_v10, %v158_v8 }
  0xac   :  { %v259_v12 = vpop.f32.mrf.mxu0 }
  0xad   :  { %v260_v13 = vadd.f32 %v259_v12, %v160_v9 }
  0xb4   :  { %v368_v14 = vpop.f32.mrf.mxu0 }
  0xb5   :  { %v415_v15 = vadd.f32 %v368_v14, %v258_v11 }
  0xbc   :  { %v370_v16 = vpop.f32.mrf.mxu0 }
  0xbd   :  { %v419_v17 = vadd.f32 %v370_v16, %v260_v13  ;;  %v794_v13 = vpop.permute.xlu0 %793 }
  0xc4   :  { %v487_v27 = vpop.f32.mrf.mxu0 }
  0xc5   :  { %v534_v30 = vadd.f32 %v487_v27, %v415_v15  ;;  %v792_v49 = vpop.permute.xlu0 %791 }
  0xcc   :  { %v489_v34 = vpop.f32.mrf.mxu0 }
  0xcd   :  { %v538_v35 = vadd.f32 %v489_v34, %v419_v17  ;;  %v790_v34 = vpop.permute.xlu1 %789 }
  0xd4   :  { %v606_v54 = vpop.f32.mrf.mxu0 }
  0xd5   :  { %v653_v63 = vadd.f32 %v606_v54, %v534_v30  ;;  %v2956_v30 = vld [vmem:[%s4123_s3 + $0x84] sm:$0xf] }
  0xd6   :  { %v2466_v39 = vor.u32 %v2956_v30, %v2463_v31  ;;  %v2513_v30 = vld [vmem:[%s4123_s3 + $0xc8] sm:$0xf]  ;;  %v2967_v31 = vld [vmem:[%s4123_s3 + $0xd4] sm:$0xf0] }
  0xd7   :  { %v670_v8 = vadd.f32 %v662_v40, %v653_v63 }
  0xd8   :  { %380 = vmatpush.bf16.msra.mxu1 %v2466_v39 }
  0xd9   :  { %v678_v9 = vmax.f32 %v670_v8, 0.0 }
  0xdb   :  { %v686_v10 = vrot.slane %v678_v9, 4  ;;  %2492 = vmatmul.msk.bf16.vlgmr.msra.gmra.mxu1 %vm75_vm0, %v3328_v37 }
  0xdc   :  { %v608_v11 = vpop.f32.mrf.mxu0 }
  0xdd   :  { %v687_v12 = vmax.f32 %v678_v9, %v686_v10  ;;  %v657_v14 = vadd.f32 %v608_v11, %v538_v35  ;;  %v788_v10 = vpop.permute.xlu1 %787 }
  0xdf   :  { %v688_v15 = vrot.slane %v687_v12, 2  ;;  %v674_v16 = vadd.f32 %v662_v40, %v657_v14  ;;  %v2959_v40 = vld [vmem:[%s4123_s3 + $0x94] sm:$0xf0] }
  0xe0   :  { %v2470_v50 = vor.u32 %v2959_v40, %v2469_v32  ;;  %v2514_v32 = vor.u32 %v2967_v31, %v2513_v30  ;;  %v3576_v40 = vld [vmem:[%s4121_s1] sm:$0x3] }
  0xe1   :  { %v689_v17 = vmax.f32 %v687_v12, %v688_v15  ;;  %v682_v18 = vmax.f32 %v674_v16, 0.0 }
  0xe2   :  { %394 = vmatpush.bf16.msra.mxu2 %v2470_v50 }
  0xe3   :  { %v710_v24 = vrot.slane %v682_v18, 4  ;;  %v690_v33 = vrot.slane %v689_v17, 1 }
  0xe4   :  { %v757_v27 = vpop.f32.mrf.mxu0 }
  0xe5   :  { %v711_v35 = vmax.f32 %v682_v18, %v710_v24  ;;  %v3512_v38 = vadd.f32 %v757_v27, %v3494_v22  ;;  %v691_v57 = vmax.f32 %v689_v17, %v690_v33  ;;  %2493 = vmatmul.msk.bf16.vlgmr.msra.gmra.mxu2 %vm75_vm0, %v3328_v37  ;;  %v2968_v17 = vld [vmem:[%s4123_s3 + $0xe4] sm:$0xf]  ;;  %v2523_v18 = vld [vmem:[%s4123_s3 + $0xf0] sm:$0xf0]  ;;  %v786_v27 = vpop.permute.xlu2 %785 }
  0xe6   :  { %v2526_v19 = vor.u32 %v2968_v17, %v2523_v18  ;;  %v2964_v24 = vld [vmem:[%s4123_s3 + $0xc4] sm:$0xf] }
  0xe7   :  { %v712_v43 = vrot.slane %v711_v35, 2  ;;  %v810_v53 = vmul.f32 %v794_v13, %v3512_v38  ;;  %v809_v54 = vmul.f32 %v792_v49, %v3512_v38  ;;  %v808_v56 = vmul.f32 %v790_v34, %v3512_v38 }
  0xe8   :  { %v1529_v0 = vpack.c.bf16 %v691_v57, %v691_v57  ;;  %v807_v14 = vmul.f32 %v788_v10, %v3512_v38  ;;  %498 = vmatpush.bf16.msrb.mxu1 %v2526_v19  ;;  %v2510_v29 = vor.u32 %v2964_v24, %v2507_v25  ;;  %v172_v25 = vpop.f32.mrf.mxu1 }
  0xe9   :  { %v713_v61 = vmax.f32 %v711_v35, %v712_v43  ;;  %881 = vrot.lane.b32.xlu2 %v810_v53, %s3196_s0  ;;  %879 = vrot.lane.b32.xlu1 %v809_v54, %s3196_s0  ;;  %v2976_v53 = vld [vmem:[%s4123_s3 + $0x124] sm:$0xf]  ;;  %v2567_v54 = vld [vmem:[%s4123_s3 + $0x130] sm:$0xf0] }
  0xea   :  { %877 = vrot.lane.b32.xlu0 %v808_v56, %s3196_s0  ;;  %v1545_v15 = vunpack.c.l.b16 %v1529_v0  ;;  %v2603_v56 = vadd.f32 -1.0, %v3576_v40  ;;  %v2570_v57 = vor.u32 %v2976_v53, %v2567_v54  ;;  %v2972_v0 = vld [vmem:[%s4123_s3 + $0x104] sm:$0xf] }
  0xeb   :  { %v714_v62 = vrot.slane %v713_v61, 1 }
  0xec   :  { %v760_v63 = vpop.f32.mrf.mxu0  ;;  %499 = vmatpush.bf16.msrb.mxu1 %v2510_v29 }
  0xed   :  { %v715_v4 = vmax.f32 %v713_v61, %v714_v62  ;;  %v3526_v8 = vadd.f32 %v760_v63, %v3494_v22  ;;  %v784_v39 = vpop.permute.xlu2 %783  ;;  %v2573_v61 = vld [vmem:[%s4123_s3 + $0x128] sm:$0xf]  ;;  %v2979_v62 = vld [vmem:[%s4123_s3 + $0x134] sm:$0xf0] }
  0xee   :  { %v805_v50 = vmul.f32 %v784_v39, %v3512_v38  ;;  %v2574_v63 = vor.u32 %v2979_v62, %v2573_v61 }
  0xef   :  { %v1533_v9 = vpack.c.bf16 %v715_v4, %v715_v4  ;;  %v816_v11 = vmul.f32 %v790_v34, %v3526_v8  ;;  %v818_v12 = vmul.f32 %v794_v13, %v3526_v8  ;;  %v2529_v13 = vld [vmem:[%s4123_s3 + $0xe8] sm:$0xf]  ;;  %v817_v33 = vmul.f32 %v792_v49, %v3526_v8  ;;  %2536 = vmatmul.msk.bf16.vlgmr.msrb.gmra.mxu1 %vm75_vm0, %v3377_v55  ;;  %v2551_v4 = vld [vmem:[%s4123_s3 + $0x110] sm:$0xf0] }
  0xf0   :  { %v2530_v23 = vor.u32 %v2971_v21, %v2529_v13  ;;  %v806_v34 = vmul.f32 %v786_v27, %v3512_v38  ;;  %v815_v35 = vmul.f32 %v788_v10, %v3526_v8  ;;  %v814_v43 = vmul.f32 %v786_v27, %v3526_v8  ;;  %617 = vmatpush.bf16.msra.mxu1 %v2570_v57  ;;  %v186_v27 = vpop.f32.mrf.mxu2 }
  0xf1   :  { %v1549_v16 = vunpack.c.l.b16 %v1533_v9  ;;  %940 = vrot.lane.b32.xlu1 %v816_v11, %s3196_s0  ;;  %875 = vrot.lane.b32.xlu2 %v807_v14, %s3196_s0  ;;  %v813_v49 = vmul.f32 %v784_v39, %v3526_v8  ;;  %v2557_v9 = vld [vmem:[%s4123_s3 + $0x108] sm:$0xf]  ;;  %v2554_v10 = vor.u32 %v2972_v0, %v2551_v4  ;;  %v2975_v11 = vld [vmem:[%s4123_s3 + $0x114] sm:$0xf0]  ;;  %v782_v14 = vpop.permute.xlu0 %781 }
  0xf2   :  { %944 = vrot.lane.b32.xlu0 %v818_v12, %s3196_s0  ;;  %512 = vmatpush.bf16.msrb.mxu2 %v2530_v23  ;;  %v780_v12 = vpop.permute.xlu1 %779  ;;  %v804_v18 = vmul.f32 %v782_v14, %v3512_v38  ;;  %v812_v19 = vmul.f32 %v782_v14, %v3526_v8 }
  0xf3   :  { %v3555_v26 = vsel %vm1321_vm2, %v1549_v16, %v1545_v15  ;;  %v2558_v15 = vor.u32 %v2975_v11, %v2557_v9  ;;  %v988_v16 = vmul.f32 1e+09, %v2603_v56  ;;  %v803_v17 = vmul.f32 %v780_v12, %v3512_v38 }
  0xf4   :  { %618 = vmatpush.bf16.msra.mxu1 %v2554_v10  ;;  %v811_v23 = vmul.f32 %v780_v12, %v3526_v8 }
  0xf5   :  { %v990_v13 = vrot.slane %v988_v16, 1  ;;  %v991_v57 = vperm.slane %v988_v16, 0 }
  0xf6   :  { %513 = vmatpush.bf16.msrb.mxu2 %v2514_v32 }
  0xf7   :  { %v992_v21 = vperm.slane %v990_v13, 0 }
  0xf8   :  { %v188_v29 = vpop.f32.mrf.mxu2 }
  0xf9   :  { %942 = vrot.lane.b32.xlu2 %v817_v33, %s3196_s0  ;;  %873 = vrot.lane.b32.xlu1 %v806_v34, %s3196_s0 }
  0xfa   :  { %938 = vrot.lane.b32.xlu0 %v815_v35, %s3196_s0  ;;  %2537 = vmatmul.msk.bf16.vlgmr.msrb.gmra.mxu2 %vm75_vm0, %v3377_v55 }
  0xfb   :  { %631 = vmatpush.bf16.msra.mxu2 %v2574_v63 }
  0xff   :  { %632 = vmatpush.bf16.msra.mxu2 %v2558_v15  ;;  %2580 = vmatmul.msk.bf16.vlgmr.msra.gmra.mxu1 %vm75_vm0, %v3402_v3 }
 0x100   :  { %v285_v33 = vpop.f32.mrf.mxu2 }
 0x101   :  { %936 = vrot.lane.b32.xlu2 %v814_v43, %s3196_s0  ;;  %934 = vrot.lane.b32.xlu1 %v813_v49, %s3196_s0 }
 0x102   :  { %871 = vrot.lane.b32.xlu0 %v805_v50, %s3196_s0 }
 0x108   :  { %v287_v43 = vpop.f32.mrf.mxu2 }
 0x109   :  { %869 = vrot.lane.b32.xlu2 %v804_v18, %s3196_s0  ;;  %867 = vrot.lane.b32.xlu1 %v803_v17, %s3196_s0  ;;  %v288_v49 = vadd.f32 %v287_v43, %v188_v29 }
 0x10a   :  { %932 = vrot.lane.b32.xlu0 %v812_v19, %s3196_s0  ;;  %2581 = vmatmul.msk.bf16.vlgmr.msra.gmra.mxu2 %vm75_vm0, %v3402_v3 }
 0x111   :  { %930 = vrot.lane.b32.xlu2 %v811_v23, %s3196_s0  ;;  %995 = vrot.lane.b32.xlu1 %v992_v21, %s3196_s0 }
 0x112   :  { %993 = vrot.lane.b32.xlu0 %v991_v57, %s3196_s0  ;;  %v2953_v57 = vld [vmem:[%s4123_s3 + $0x6c] sm:$0xf] }
 0x119   :  { %833 = vrot.lane.b32.xlu1 %v3369_v51, %s3192_s10  ;;  %v174_v51 = vpop.f32.mrf.mxu1 }
 0x121   :  { %831 = vrot.lane.b32.xlu1 %v3384_v58, %s3192_s10  ;;  %v271_v30 = vpop.f32.mrf.mxu1 }
 0x122   :  { %v272_v31 = vadd.f32 %v271_v30, %v172_v25 }
 0x129   :  { %829 = vrot.lane.b32.xlu1 %v3371_v52, %s3192_s10 }
 0x131   :  { %827 = vrot.lane.b32.xlu1 %v3386_v59, %s3192_s10  ;;  %v273_v59 = vpop.f32.mrf.mxu1 }
 0x139   :  { %825 = vrot.lane.b32.xlu1 %v3400_v2, %s3192_s10  ;;  %v274_v2 = vadd.f32 %v273_v59, %v174_v51  ;;  %v663_v51 = vperm.slane %v3454_v36, 1 }
 0x141   :  { %821 = vrot.lane.b32.xlu1 %v3398_v1, %s3192_s10  ;;  %v286_v1 = vadd.f32 %v285_v33, %v186_v27  ;;  %v664_v33 = vperm.slane %v3454_v36, 2 }
 0x143   :  { %v882_v24 = vpop.permute.xlu2 %881 }
 0x144   :  { %2585 = vmatpush.xpose.msk.msrb.mxu1 %vm75_vm0, %v882_v24 }
 0x14b   :  { %v876_v58 = vpop.permute.xlu2 %875 }
 0x153   :  { %v943_v34 = vpop.permute.xlu2 %942 }
 0x158   :  { %v382_v50 = vpop.f32.mrf.mxu1 }
 0x159   :  { %v416_v53 = vadd.f32 %v382_v50, %v272_v31 }
 0x15b   :  { %v880_v52 = vpop.permute.xlu1 %879  ;;  %v937_v54 = vpop.permute.xlu2 %936 }
 0x15c   :  { %v878_v32 = vpop.permute.xlu0 %877  ;;  %2586 = vmatpush.xpose.msk.msrb.mxu1 %vm75_vm0, %v880_v52 }
 0x160   :  { %2587 = vmatpush.xpose.msk.msrb.mxu1 %vm75_vm0, %v878_v32  ;;  %v384_v62 = vpop.f32.mrf.mxu1 }
 0x161   :  { %v420_v0 = vadd.f32 %v384_v62, %v274_v2  ;;  %v2949_v62 = vld [vmem:[%s4123_s3 + $0x4c] sm:$0xf] }
 0x163   :  { %v941_v35 = vpop.permute.xlu1 %940  ;;  %v870_v11 = vpop.permute.xlu2 %869 }
 0x164   :  { %v945_v39 = vpop.permute.xlu0 %944  ;;  %2588 = vmatpush.xpose.msk.msrb.mxu1 %vm75_vm0, %v876_v58 }
 0x165   :  { %2594 = vmatpush.xpose.msk.msrb.mxu2 %vm75_vm0, %v945_v39 }
 0x168   :  { %v396_v63 = vpop.f32.mrf.mxu2 }
 0x169   :  { %2595 = vmatpush.xpose.msk.msrb.mxu2 %vm75_vm0, %v943_v34  ;;  %v417_v4 = vadd.f32 %v396_v63, %v286_v1 }
 0x16b   :  { %v874_v56 = vpop.permute.xlu1 %873  ;;  %v931_v19 = vpop.permute.xlu2 %930 }
 0x16c   :  { %v939_v61 = vpop.permute.xlu0 %938  ;;  %2589 = vmatpush.xpose.msk.msrb.mxu1 %vm75_vm0, %v874_v56  ;;  %v501_v14 = vpop.f32.mrf.mxu1 }
 0x16d   :  { %2596 = vmatpush.xpose.msk.msrb.mxu2 %vm75_vm0, %v941_v35  ;;  %v535_v16 = vadd.f32 %v501_v14, %v416_v53  ;;  %v2443_v14 = vld [vmem:[%s4123_s3 + $0x38] sm:$0xf0] }
 0x170   :  { %v398_v12 = vpop.f32.mrf.mxu2 }
 0x171   :  { %2597 = vmatpush.xpose.msk.msrb.mxu2 %vm75_vm0, %v939_v61  ;;  %v421_v15 = vadd.f32 %v398_v12, %v288_v49  ;;  %v2407_v61 = vld [vmem:[%s4123_s3 + $0x78] sm:$0xf0] }
 0x173   :  { %v935_v9 = vpop.permute.xlu1 %934 }
 0x174   :  { %v872_v10 = vpop.permute.xlu0 %871  ;;  %v503_v13 = vpop.f32.mrf.mxu1 }
 0x175   :  { %2590 = vmatpush.xpose.msk.msrb.mxu1 %vm75_vm0, %v872_v10  ;;  %2598 = vmatpush.xpose.msk.msrb.mxu2 %vm75_vm0, %v937_v54  ;;  %v539_v23 = vadd.f32 %v503_v13, %v420_v0  ;;  %v2391_v10 = vld [vmem:[%s4123_s3 + $0x58] sm:$0xf0] }
 0x179   :  { %2591 = vmatpush.xpose.msk.msrb.mxu1 %vm75_vm0, %v870_v11  ;;  %2599 = vmatpush.xpose.msk.msrb.mxu2 %vm75_vm0, %v935_v9  ;;  %v2410_v9 = vor.u32 %v2953_v57, %v2407_v61  ;;  %v2945_v11 = vld [vmem:[%s4123_s3 + $0x2c] sm:$0xf] }
 0x17a   :  { %v2446_v13 = vor.u32 %v2945_v11, %v2443_v14 }
 0x17b   :  { %v868_v17 = vpop.permute.xlu1 %867  ;;  %197 = vmatpush.bf16.msra.mxu3 %v2410_v9 }
 0x17c   :  { %v933_v18 = vpop.permute.xlu0 %932  ;;  %v620_v29 = vpop.f32.mrf.mxu1 }
 0x17d   :  { %2592 = vmatpush.xpose.msk.msrb.mxu1 %vm75_vm0, %v868_v17  ;;  %2600 = vmatpush.xpose.msk.msrb.mxu2 %vm75_vm0, %v933_v18  ;;  %v515_v21 = vpop.f32.mrf.mxu2  ;;  %v654_v30 = vadd.f32 %v620_v29, %v535_v16  ;;  %v2394_v18 = vor.u32 %v2949_v62, %v2391_v10  ;;  %v2961_v29 = vld [vmem:[%s4123_s3 + $0xac] sm:$0xf] }
 0x17e   :  { %v536_v24 = vadd.f32 %v515_v21, %v417_v4 }
 0x17f   :  { %v671_v52 = vadd.f32 %v663_v51, %v654_v30  ;;  %v2487_v30 = vld [vmem:[%s4123_s3 + $0xb8] sm:$0xf0]  ;;  %198 = vmatpush.bf16.msra.mxu3 %v2394_v18 }
 0x180   :  { %2593 = vmatmul.msk.f32.vlgmr.msrb.gmra.mxu1 %vm75_vm0, %v3512_v38 }
 0x181   :  { %2601 = vmatpush.xpose.msk.msrb.mxu2 %vm75_vm0, %v931_v19  ;;  %v679_v32 = vmax.f32 %v671_v52, 0.0 }
 0x182   :  { %2414 = vmatmul.msk.bf16.vlgmr.msra.gmra.mxu3 %vm75_vm0, %v3296_v20 }
 0x183   :  { %v3653_v25 = vpop.permute.xlu1 %995  ;;  %v692_v59 = vrot.slane %v679_v32, 4  ;;  %296 = vmatpush.bf16.msrb.mxu3 %v2446_v13 }
 0x184   :  { %2602 = vmatmul.msk.f32.vlgmr.msrb.gmra.mxu2 %vm75_vm0, %v3526_v8  ;;  %v622_v2 = vpop.f32.mrf.mxu1 }
 0x185   :  { %v517_v27 = vpop.f32.mrf.mxu2  ;;  %v693_v34 = vmax.f32 %v679_v32, %v692_v59  ;;  %v658_v35 = vadd.f32 %v622_v2, %v539_v23 }
 0x186   :  { %v540_v58 = vadd.f32 %v517_v27, %v421_v15  ;;  %v2427_v27 = vld [vmem:[%s4123_s3 + $0x18] sm:$0xf0] }
 0x187   :  { %v694_v49 = vrot.slane %v693_v34, 2  ;;  %v675_v50 = vadd.f32 %v663_v51, %v658_v35  ;;  %v2941_v51 = vld [vmem:[%s4123_s3 + $0xc] sm:$0xf] }
 0x189   :  { %v695_v63 = vmax.f32 %v693_v34, %v694_v49  ;;  %v683_v0 = vmax.f32 %v675_v50, 0.0  ;;  %v2490_v49 = vor.u32 %v2961_v29, %v2487_v30  ;;  %v2957_v50 = vld [vmem:[%s4123_s3 + $0x8c] sm:$0xf] }
 0x18b   :  { %v3658_v31 = vpop.permute.xlu1 %833  ;;  %v696_v15 = vrot.slane %v695_v63, 1  ;;  %v716_v16 = vrot.slane %v683_v0, 4 }
 0x18c   :  { %v850_v54 = vmul.f32 %v3658_v31, %v3512_v38 }
 0x18d   :  { %v634_v1 = vpop.f32.mrf.mxu2  ;;  %v717_v21 = vmax.f32 %v683_v0, %v716_v16  ;;  %v697_v32 = vmax.f32 %v695_v63, %v696_v15 }
 0x18e   :  { %v655_v39 = vadd.f32 %v634_v1, %v536_v24  ;;  %v2430_v1 = vor.u32 %v2941_v51, %v2427_v27  ;;  %v2531_v51 = vld [vmem:[%s4123_s3 + $0xf8] sm:$0xf0] }
 0x18f   :  { %v718_v59 = vrot.slane %v717_v21, 2 }
 0x190   :  { %v672_v53 = vadd.f32 %v664_v33, %v655_v39  ;;  %297 = vmatpush.bf16.msrb.mxu3 %v2430_v1 }
 0x191   :  { %v719_v34 = vmax.f32 %v717_v21, %v718_v59  ;;  %v858_v59 = vmul.f32 %v3658_v31, %v3526_v8  ;;  %v2977_v31 = vld [vmem:[%s4123_s3 + $0x12c] sm:$0xf] }
 0x192   :  { %v680_v4 = vmax.f32 %v672_v53, 0.0  ;;  %v2471_v53 = vld [vmem:[%s4123_s3 + $0x98] sm:$0xf0] }
 0x193   :  { %v3661_v43 = vpop.permute.xlu1 %831  ;;  %v2474_v63 = vor.u32 %v2957_v50, %v2471_v53  ;;  %2450 = vmatmul.msk.bf16.vlgmr.msrb.gmra.mxu3 %vm75_vm0, %v3312_v28  ;;  %v2973_v28 = vld [vmem:[%s4123_s3 + $0x10c] sm:$0xf]  ;;  %v2559_v50 = vld [vmem:[%s4123_s3 + $0x118] sm:$0xf0] }
 0x194   :  { %v849_v56 = vmul.f32 %v3661_v43, %v3512_v38  ;;  %v698_v17 = vrot.slane %v680_v4, 4  ;;  %407 = vmatpush.bf16.msra.mxu3 %v2490_v49  ;;  %v857_v29 = vmul.f32 %v3661_v43, %v3526_v8  ;;  %v2562_v53 = vor.u32 %v2973_v28, %v2559_v50 }
 0x195   :  { %v636_v19 = vpop.f32.mrf.mxu2 }
 0x196   :  { %v3069_v12 = vpack.i.bf16 %v849_v56, %v850_v54  ;;  %v699_v23 = vmax.f32 %v680_v4, %v698_v17  ;;  %v659_v24 = vadd.f32 %v636_v19, %v540_v58  ;;  %v1530_v54 = vpack.c.bf16 %v697_v32, %v697_v32 }
 0x198   :  { %3070 = vrot.lane.b32.xlu1 %v3069_v12, %s3192_s10  ;;  %v700_v58 = vrot.slane %v699_v23, 2  ;;  %v676_v2 = vadd.f32 %v664_v33, %v659_v24  ;;  %v720_v33 = vrot.slane %v719_v34, 1  ;;  %v1546_v4 = vunpack.c.l.b16 %v1530_v54  ;;  %408 = vmatpush.bf16.msra.mxu3 %v2474_v63  ;;  %v2969_v24 = vld [vmem:[%s4123_s3 + $0xec] sm:$0xf]  ;;  %v62_v54 = vld [vmem:[%s4122_s2 + $0x60] sm:$0xff] }
 0x199   :  { %v2534_v32 = vor.u32 %v2969_v24, %v2531_v51 }
 0x19a   :  { %v701_v35 = vmax.f32 %v699_v23, %v700_v58  ;;  %v684_v39 = vmax.f32 %v676_v2, 0.0  ;;  %v721_v61 = vmax.f32 %v719_v34, %v720_v33  ;;  %v2965_v58 = vld [vmem:[%s4123_s3 + $0xcc] sm:$0xf]  ;;  %v2515_v2 = vld [vmem:[%s4123_s3 + $0xd8] sm:$0xf0]  ;;  %v3089_v34 = vpack.i.bf16 %v857_v29, %v858_v59 }
 0x19b   :  { %v830_v52 = vpop.permute.xlu1 %829  ;;  %v2518_v43 = vor.u32 %v2965_v58, %v2515_v2  ;;  %v59_v33 = vld [vmem:[%s4122_s2 + $0x48] sm:$0xff] }
 0x19c   :  { %v702_v56 = vrot.slane %v701_v35, 1  ;;  %v722_v57 = vrot.slane %v684_v39, 4  ;;  %v1534_v20 = vpack.c.bf16 %v721_v61, %v721_v61  ;;  %v848_v11 = vmul.f32 %v830_v52, %v3512_v38  ;;  %526 = vmatpush.bf16.msrb.mxu3 %v2534_v32  ;;  %v56_v61 = vld [vmem:[%s4122_s2 + $0x30] sm:$0xff] }
 0x19d   :  { %v3708_v12 = vmul.f32 %v830_v52, %v3526_v8 }
 0x19e   :  { %v723_v62 = vmax.f32 %v684_v39, %v722_v57  ;;  %v703_v9 = vmax.f32 %v701_v35, %v702_v56  ;;  %v1550_v16 = vunpack.c.l.b16 %v1534_v20  ;;  %v2575_v39 = vld [vmem:[%s4123_s3 + $0x138] sm:$0xf0]  ;;  %v58_v56 = vld [vmem:[%s4122_s2 + $0x40] sm:$0xff]  ;;  %s2356_s3 = sshll.u32 %s3199_s20, 4  ;;  %s2357_s3 = int_to_ptr.vmem [resolvable:$true] %s2356_s3 }
 0x19f   :  { %v2578_v49 = vor.u32 %v2977_v31, %v2575_v39  ;;  %v57_v57 = vld [vmem:[%s4122_s2 + $0x38] sm:$0xff] }
 0x1a0   :  { %v724_v10 = vrot.slane %v723_v62, 2  ;;  %v1531_v13 = vpack.c.bf16 %v703_v9, %v703_v9  ;;  %v3717_v23 = vsel %vm1321_vm2, %v1550_v16, %v1546_v4  ;;  %527 = vmatpush.bf16.msrb.mxu3 %v2518_v43 }
 0x1a2   :  { %v725_v17 = vmax.f32 %v723_v62, %v724_v10  ;;  %v1547_v30 = vunpack.c.l.b16 %v1531_v13 }
 0x1a3   :  { %v828_v0 = vpop.permute.xlu1 %827  ;;  %2494 = vmatmul.msk.bf16.vlgmr.msra.gmra.mxu3 %vm75_vm0, %v3328_v37  ;;  %v61_v37 = vld [vmem:[%s4122_s2 + $0x58] sm:$0xff] }
 0x1a4   :  { %v847_v14 = vmul.f32 %v828_v0, %v3512_v38  ;;  %v3712_v15 = vmul.f32 %v828_v0, %v3526_v8  ;;  %v726_v21 = vrot.slane %v725_v17, 1  ;;  %645 = vmatpush.bf16.msra.mxu3 %v2578_v49  ;;  %v994_v0 = vpop.permute.xlu0 %993 }
 0x1a6   :  { %v3074_v18 = vpack.i.bf16 %v847_v14, %v848_v11  ;;  %v3094_v19 = vpack.i.bf16 %v3712_v15, %v3708_v12  ;;  %v727_v27 = vmax.f32 %v725_v17, %v726_v21 }
 0x1a8   :  { %3075 = vrot.lane.b32.xlu1 %v3074_v18, %s3192_s10  ;;  %v1535_v52 = vpack.c.bf16 %v727_v27, %v727_v27  ;;  %646 = vmatpush.bf16.msra.mxu3 %v2562_v53 }
 0x1aa   :  { %v1551_v1 = vunpack.c.l.b16 %v1535_v52 }
 0x1ab   :  { %v3784_v62 = vpop.permute.xlu1 %825 }
 0x1ac   :  { %v3739_v35 = vsel %vm1321_vm2, %v1551_v1, %v1547_v30 }
 0x1b0   :  { %3090 = vrot.lane.b32.xlu1 %v3089_v34, %s3192_s10 }
 0x1b3   :  { %2538 = vmatmul.msk.bf16.vlgmr.msrb.gmra.mxu3 %vm75_vm0, %v3377_v55  ;;  %v60_v55 = vld [vmem:[%s4122_s2 + $0x50] sm:$0xff]  ;;  %v3786_v9 = vpop.permute.xlu1 %821 }
 0x1b4   :  { %1028 = vmatpush.msrb.mxu3 %v62_v54  ;;  %v852_v12 = vmul.f32 %v3786_v9, %v3526_v8 }
 0x1b6   :  { %1029 = vmatpush.msrb.mxu3 %v61_v37 }
 0x1b8   :  { %1030 = vmatpush.msrb.mxu3 %v60_v55  ;;  %v1231_v55 = vlaneseq }
 0x1ba   :  { %1031 = vmatpush.msrb.mxu3 %v59_v33 }
 0x1bc   :  { %1032 = vmatpush.msrb.mxu3 %v58_v56 }
 0x1be   :  { %1033 = vmatpush.msrb.mxu3 %v57_v57 }
 0x1c0   :  { %1034 = vmatpush.msrb.mxu3 %v56_v61  ;;  %v1232_v61 = vshrl.u32 %v1231_v55, 7 }
 0x1c3   :  { %2582 = vmatmul.msk.bf16.vlgmr.msra.gmra.mxu3 %vm75_vm0, %v3402_v3  ;;  %v55_v3 = vld [vmem:[%s4122_s2 + $0x28] sm:$0xff] }
 0x1c4   :  { %1035 = vmatpush.msrb.mxu3 %v55_v3 }
 0x1fd   :  { %v919_v63 = vpop.f32.mrf.mxu1 }
 0x1fe   :  { %v985_v4 = vmul.f32 0.5, %v919_v63  ;;  %v1233_v63 = vadd.s32 32, %v1232_v61 }
 0x200   :  { %v999_v20 = vadd.f32 %v994_v0, %v985_v4  ;;  %3120 = vset.pattern.permute.xlu0 %v1233_v63  ;;  %3119 = vset.pattern.permute.xlu2 %v1233_v63  ;;  %v2981_v63 = vld [vmem:[%s4124_s4 + $0x8] sm:$0xff] }
 0x202   :  { %v1002_v10 = vsel %vm1001_vm3, %v999_v20, -inf }
 0x203   :  { %1003 = vmax.xlane.f32.xlu2 %v1002_v10  ;;  %v665_v10 = vperm.slane %v3454_v36, 3 }
 0x205   :  { %v200_v52 = vpop.f32.mrf.mxu3 }
 0x207   :  { %v982_v11 = vpop.f32.mrf.mxu2 }
 0x208   :  { %v986_v14 = vmul.f32 0.5, %v982_v11 }
 0x20a   :  { %v3071_v16 = vpop.permute.xlu1 %3070  ;;  %v1000_v17 = vadd.f32 %v3653_v25, %v986_v14 }
 0x20b   :  { %v3072_v18 = vunpack.i.l.bf16 %v3071_v16  ;;  %v3073_v21 = vunpack.i.h.bf16 %v3071_v16 }
 0x20c   :  { %v1005_v13 = vsel %vm1001_vm3, %v1000_v17, -inf }
 0x20d   :  { %1006 = vmax.xlane.f32.xlu0 %v1005_v13  ;;  %1115 = vmatpush.msra.mxu3 %v3072_v18  ;;  %v202_v32 = vpop.f32.mrf.mxu3 }
 0x20f   :  { %1116 = vmatpush.msra.mxu3 %v3073_v21 }
 0x216   :  { %v299_v59 = vpop.f32.mrf.mxu3 }
 0x217   :  { %v300_v58 = vadd.f32 %v299_v59, %v200_v52 }
 0x21a   :  { %v3076_v24 = vpop.permute.xlu1 %3075 }
 0x21b   :  { %v3077_v51 = vunpack.i.l.bf16 %v3076_v24  ;;  %823 = vrot.lane.b32.xlu2 %v3414_v5, %s3192_s10  ;;  %v3078_v27 = vunpack.i.h.bf16 %v3076_v24 }
 0x21d   :  { %1117 = vmatpush.msra.mxu3 %v3077_v51 }
 0x21e   :  { %v301_v2 = vpop.f32.mrf.mxu3 }
 0x21f   :  { %1118 = vmatpush.msra.mxu3 %v3078_v27  ;;  %v302_v1 = vadd.f32 %v301_v2, %v202_v32  ;;  %v1230_v27 = vperm.slane %v3576_v40, 0 }
 0x221   :  { %819 = vrot.lane.b32.xlu0 %v771_v60, %s3192_s10  ;;  %v846_v60 = vmul.f32 %v3784_v62, %v3512_v38 }
 0x222   :  { %v3091_v25 = vpop.permute.xlu1 %3090 }
 0x223   :  { %v3092_v29 = vunpack.i.l.bf16 %v3091_v25  ;;  %v3093_v30 = vunpack.i.h.bf16 %v3091_v25 }
 0x225   :  { %1167 = vmatpush.msrb.mxu0 %v3092_v29 }
 0x226   :  { %v410_v34 = vpop.f32.mrf.mxu3 }
 0x227   :  { %1168 = vmatpush.msrb.mxu0 %v3093_v30  ;;  %v418_v5 = vadd.f32 %v410_v34, %v300_v58 }
 0x22e   :  { %v412_v39 = vpop.f32.mrf.mxu3 }
 0x22f   :  { %v422_v49 = vadd.f32 %v412_v39, %v302_v1  ;;  %v1237_v39 = vperm.slane %v3576_v40, 1 }
 0x236   :  { %v529_v53 = vpop.f32.mrf.mxu3 }
 0x237   :  { %v537_v37 = vadd.f32 %v529_v53, %v418_v5 }
 0x23e   :  { %v531_v0 = vpop.f32.mrf.mxu3 }
 0x23f   :  { %v541_v4 = vadd.f32 %v531_v0, %v422_v49 }
 0x246   :  { %v648_v11 = vpop.f32.mrf.mxu3 }
 0x247   :  { %v656_v14 = vadd.f32 %v648_v11, %v537_v37 }
 0x249   :  { %v673_v16 = vadd.f32 %v665_v10, %v656_v14  ;;  %v3003_v14 = vld [vmem:[%s4124_s4 + $0xb8] sm:$0xff] }
 0x24b   :  { %v681_v36 = vmax.f32 %v673_v16, 0.0 }
 0x24d   :  { %v704_v24 = vrot.slane %v681_v36, 4 }
 0x24e   :  { %v650_v51 = vpop.f32.mrf.mxu3 }
 0x24f   :  { %v705_v41 = vmax.f32 %v681_v36, %v704_v24  ;;  %v660_v42 = vadd.f32 %v650_v51, %v541_v4 }
 0x251   :  { %v677_v25 = vadd.f32 %v665_v10, %v660_v42  ;;  %v2980_v10 = vld [vmem:[%s4124_s4] sm:$0xff] }
 0x253   :  { %v685_v30 = vmax.f32 %v677_v25, 0.0  ;;  %v2999_v25 = vld [vmem:[%s4124_s4 + $0x98] sm:$0xff] }
 0x255   :  { %v728_v32 = vrot.slane %v685_v30, 4 }
 0x257   :  { %v729_v58 = vmax.f32 %v685_v30, %v728_v32 }
 0x259   :  { %v730_v2 = vrot.slane %v729_v58, 2 }
 0x25b   :  { %v731_v34 = vmax.f32 %v729_v58, %v730_v2  ;;  %v2997_v2 = vld [vmem:[%s4124_s4 + $0x88] sm:$0xff] }
 0x25d   :  { %v732_v5 = vrot.slane %v731_v34, 1 }
 0x276   :  { %v1004_v43 = vpop.xlane.xlu2 %1003 }
 0x277   :  { %v1008_v31 = vsub.f32 %v999_v20, %v1004_v43 }
 0x279   :  { %v1010_v28 = vmul.f32 1.442695, %v1008_v31 }
 0x27b   :  { %3121 = vpow2.f32 %v1010_v28 }
 0x27e   :  { %v824_v47 = vpop.permute.xlu2 %823 }
 0x27f   :  { %v845_v50 = vmul.f32 %v824_v47, %v3512_v38 }
 0x280   :  { %v1007_v54 = vpop.xlane.xlu0 %1006 }
 0x281   :  { %v3799_v33 = vpop.eup %3121  ;;  %v1009_v56 = vsub.f32 %v1000_v17, %v1007_v54  ;;  %v3079_v57 = vpack.i.bf16 %v845_v50, %v846_v60  ;;  %v844_v17 = vmul.f32 %v3786_v9, %v3512_v38  ;;  %v706_v9 = vrot.slane %v705_v41, 2 }
 0x282   :  { %2604 = vmatmul.msk.f32.vlgmr.msrb.gmra.mxu3 %vm1001_vm3, %v3799_v33 }
 0x283   :  { %v1012_v3 = vmul.f32 1.442695, %v1009_v56  ;;  %3080 = vrot.lane.b32.xlu2 %v3079_v57, %s3192_s10  ;;  %v707_v29 = vmax.f32 %v705_v41, %v706_v9  ;;  %v3000_v41 = vld [vmem:[%s4124_s4 + $0xa0] sm:$0xff] }
 0x285   :  { %3123 = vpow2.f32 %v1012_v3  ;;  %v708_v59 = vrot.slane %v707_v29, 1 }
 0x287   :  { %v709_v1 = vmax.f32 %v707_v29, %v708_v59 }
 0x289   :  { %v1532_v43 = vpack.c.bf16 %v709_v1, %v709_v1 }
 0x28b   :  { %v3804_v20 = vpop.eup %3123  ;;  %3095 = vrot.lane.b32.xlu2 %v3094_v19, %s3192_s10  ;;  %v1548_v31 = vunpack.c.l.b16 %v1532_v43 }
 0x28c   :  { %2605 = vmatmul.msk.f32.gmra.mxu3 %vm1001_vm3, %v3804_v20 }
 0x293   :  { %v820_v18 = vpop.permute.xlu0 %819  ;;  %3110 = vrot.lane.b32.xlu2 %v3109_v44, %s3195_s19  ;;  %v853_v44 = vmul.f32 %v824_v47, %v3526_v8 }
 0x294   :  { %v843_v15 = vmul.f32 %v820_v18, %v3512_v38  ;;  %v851_v19 = vmul.f32 %v820_v18, %v3526_v8  ;;  %v854_v38 = vmul.f32 %v3784_v62, %v3526_v8  ;;  %v733_v8 = vmax.f32 %v731_v34, %v732_v5 }
 0x296   :  { %v3104_v13 = vpack.i.bf16 %v851_v19, %v852_v12  ;;  %v3084_v21 = vpack.i.bf16 %v843_v15, %v844_v17  ;;  %v3099_v52 = vpack.i.bf16 %v853_v44, %v854_v38  ;;  %v1536_v62 = vpack.c.bf16 %v733_v8, %v733_v8  ;;  %v3002_v15 = vld [vmem:[%s4124_s4 + $0xb0] sm:$0xff] }
 0x298   :  { %3105 = vrot.lane.b32.xlu1 %v3104_v13, %s3192_s10  ;;  %3085 = vrot.lane.b32.xlu0 %v3084_v21, %s3192_s10  ;;  %v1552_v49 = vunpack.c.l.b16 %v1536_v62  ;;  %v3001_v21 = vld [vmem:[%s4124_s4 + $0xa8] sm:$0xff] }
 0x29a   :  { %v3840_v28 = vsel %vm1321_vm2, %v1552_v49, %v1548_v31  ;;  %v1558_v31 = vpack.c.b16 %v3717_v23, %v3717_v23 }
 0x29b   :  { %1235 = vperm.xlu2 %3119, %v1230_v27  }
 0x2a0   :  { %3100 = vrot.lane.b32.xlu0 %v3099_v52, %s3192_s10  ;;  %1261 = vrot.lane.b32.xlu1 %v3576_v40, %s3196_s0 }
 0x2a8   :  { %3115 = vrot.lane.b32.xlu0 %v3114_v48, %s3195_s19  ;;  %1198 = vrot.lane.b32.xlu1 %v3494_v22, %s3195_s19 }
 0x2b0   :  { %1242 = vperm.xlu0 %3120, %v1237_v39  }
 0x2dd   :  { %v3081_v47 = vpop.permute.xlu2 %3080 }
 0x2de   :  { %v3082_v60 = vunpack.i.l.bf16 %v3081_v47  ;;  %v3083_v50 = vunpack.i.h.bf16 %v3081_v47 }
 0x2e0   :  { %1119 = vmatpush.msra.mxu3 %v3082_v60  ;;  %v2987_v60 = vld [vmem:[%s4124_s4 + $0x38] sm:$0xff] }
 0x2e2   :  { %1120 = vmatpush.msra.mxu3 %v3083_v50  ;;  %v2986_v50 = vld [vmem:[%s4124_s4 + $0x30] sm:$0xff] }
 0x2e5   :  { %v3096_v45 = vpop.permute.xlu2 %3095 }
 0x2e6   :  { %v3097_v46 = vunpack.i.l.bf16 %v3096_v45  ;;  %v3098_v48 = vunpack.i.h.bf16 %v3096_v45 }
 0x2e8   :  { %1169 = vmatpush.msrb.mxu0 %v3097_v46 }
 0x2ea   :  { %1170 = vmatpush.msrb.mxu0 %v3098_v48 }
 0x2ed   :  { %v3111_v22 = vpop.permute.xlu2 %3110 }
 0x2ee   :  { %v3113_v53 = vunpack.i.h.bf16 %v3111_v22  ;;  %v3112_v54 = vunpack.i.l.bf16 %v3111_v22  ;;  %v3019_v22 = vld [vmem:[%s4124_s4 + $0x138] sm:$0xff] }
 0x2f0   :  { %1219 = vmatpush.msra.mxu1 %v3112_v54 }
 0x2f2   :  { %1220 = vmatpush.msra.mxu1 %v3113_v53 }
 0x2f5   :  { %v3842_v61 = vpop.permute.xlu2 %1235 }
 0x2f6   :  { %v1289_v4 = vmul.f32 %v3842_v61, %v3267_v6  ;;  %v1310_v6 = vpack.c.bf16 %v3576_v40, %v3576_v40 }
 0x2f8   :  { %v1292_v17 = vsel %vm1291_vm5, %v1289_v4, -inf }
 0x2f9   :  { %v1293_v19 = vrot.slane %v1292_v17, 4 }
 0x2fb   :  { %v1294_v24 = vmax.f32 %v1292_v17, %v1293_v19  ;;  %v3012_v17 = vld [vmem:[%s4124_s4 + $0x100] sm:$0xff]  ;;  %v2985_v19 = vld [vmem:[%s4124_s4 + $0x28] sm:$0xff] }
 0x2fd   :  { %v1295_v42 = vrot.slane %v1294_v24, 2 }
 0x2ff   :  { %v1296_v44 = vmax.f32 %v1294_v24, %v1295_v42  ;;  %v3010_v24 = vld [vmem:[%s4124_s4 + $0xf0] sm:$0xff] }
 0x301   :  { %v1297_v30 = vrot.slane %v1296_v44, 1 }
 0x303   :  { %v1298_v59 = vmax.f32 %v1296_v44, %v1297_v30  ;;  %v2991_v44 = vld [vmem:[%s4124_s4 + $0x58] sm:$0xff] }
 0x305   :  { %v1037_v37 = vpop.f32.mrf.mxu3  ;;  %v1426_v5 = vpack.c.bf16 %v1298_v59, %v1298_v59  ;;  %v3007_v59 = vld [vmem:[%s4124_s4 + $0xd8] sm:$0xff] }
 0x306   :  { %3125 = vrcp.f32 %v1037_v37  ;;  %v3018_v37 = vld [vmem:[%s4124_s4 + $0x130] sm:$0xff] }
 0x307   :  { %v1430_v62 = vunpack.c.l.b16 %v1426_v5 }
 0x30a   :  { %v3086_v55 = vpop.permute.xlu0 %3085  ;;  %v3106_v18 = vpop.permute.xlu1 %3105 }
 0x30b   :  { %v3087_v56 = vunpack.i.l.bf16 %v3086_v55  ;;  %v3088_v3 = vunpack.i.h.bf16 %v3086_v55  ;;  %v3107_v36 = vunpack.i.l.bf16 %v3106_v18  ;;  %v3108_v13 = vunpack.i.h.bf16 %v3106_v18 }
 0x30c   :  { %v3126_v57 = vpop.eup %3125  ;;  %v1560_v18 = vpack.c.b16 %v3840_v28, %v3840_v28  ;;  %v2984_v28 = vld [vmem:[%s4124_s4 + $0x20] sm:$0xff] }
 0x30d   :  { %2606 = vmatmul.msk.f32.vlgmr.msra.gmra.mxu0 %vm1045_vm4, %v3126_v57  ;;  %1121 = vmatpush.msra.mxu3 %v3087_v56  ;;  %v3017_v57 = vld [vmem:[%s4124_s4 + $0x128] sm:$0xff] }
 0x30f   :  { %v1040_v0 = vpop.f32.mrf.mxu3  ;;  %1122 = vmatpush.msra.mxu3 %v3088_v3 }
 0x310   :  { %3127 = vrcp.f32 %v1040_v0  ;;  %2608 = vmatmul.msk.f32.vlgmr.msra.gmra.mxu3 %vm1001_vm3, %v3799_v33 }
 0x311   :  { %1373 = vmatpush.bf16.msrb.mxu3 %v2981_v63  ;;  %v3016_v63 = vld [vmem:[%s4124_s4 + $0x120] sm:$0xff] }
 0x312   :  { %v3101_v11 = vpop.permute.xlu0 %3100  ;;  %v1262_v45 = vpop.permute.xlu1 %1261 }
 0x313   :  { %v3102_v16 = vunpack.i.l.bf16 %v3101_v11  ;;  %v3103_v12 = vunpack.i.h.bf16 %v3101_v11  ;;  %v1265_v23 = vsel %vm1264_vm6, %v1262_v45, 0.0  ;;  %v3014_v11 = vld [vmem:[%s4124_s4 + $0x110] sm:$0xff] }
 0x314   :  { %1266 = vadd.xlane.f32.xlu2 %v1265_v23 }
 0x315   :  { %1374 = vmatpush.bf16.msrb.mxu3 %v2980_v10  ;;  %1171 = vmatpush.msrb.mxu0 %v3102_v16  ;;  %v3015_v10 = vld [vmem:[%s4124_s4 + $0x118] sm:$0xff]  ;;  %v3013_v16 = vld [vmem:[%s4124_s4 + $0x108] sm:$0xff] }
 0x316   :  { %v3128_v33 = vpop.eup %3127 }
 0x317   :  { %2607 = vmatmul.msk.f32.gmra.mxu0 %vm1045_vm4, %v3128_v33 }
 0x318   :  { %1172 = vmatpush.msrb.mxu0 %v3103_v12  ;;  %2629 = vmatmul.msk.bf16.vlgmr.msrb.gmra.mxu3 %vm75_vm0, %v1310_v6  ;;  %v2983_v12 = vld [vmem:[%s4124_s4 + $0x18] sm:$0xff] }
 0x319   :  { %1770 = vmatpush.bf16.msra.mxu3 %v3003_v14  ;;  %1345 = vmatpush.bf16.msra.mxu2 %v2983_v12 }
 0x31a   :  { %1173 = vmatpush.msrb.mxu0 %v3107_v36  ;;  %v3116_v40 = vpop.permute.xlu0 %3115  ;;  %v1199_v0 = vpop.permute.xlu1 %1198  ;;  %v2995_v36 = vld [vmem:[%s4124_s4 + $0x78] sm:$0xff] }
 0x31b   :  { %v3118_v51 = vunpack.i.h.bf16 %v3116_v40  ;;  %v3117_v27 = vunpack.i.l.bf16 %v3116_v40  ;;  %v3011_v40 = vld [vmem:[%s4124_s4 + $0xf8] sm:$0xff] }
 0x31c   :  { %1174 = vmatpush.msrb.mxu0 %v3108_v13  ;;  %v2994_v13 = vld [vmem:[%s4124_s4 + $0x70] sm:$0xff] }
 0x31d   :  { %1771 = vmatpush.bf16.msra.mxu3 %v3002_v15  ;;  %1221 = vmatpush.msra.mxu1 %v3117_v27  ;;  %v2982_v15 = vld [vmem:[%s4124_s4 + $0x10] sm:$0xff]  ;;  %v3009_v27 = vld [vmem:[%s4124_s4 + $0xe8] sm:$0xff] }
 0x31e   :  { %1346 = vmatpush.bf16.msra.mxu2 %v2982_v15  ;;  %1414 = vmatpush.bf16.msra.mxu0 %v2985_v19 }
 0x31f   :  { %2609 = vmatmul.msk.f32.vlgmr.msrb.gmra.mxu0 %vm1001_vm3, %v3804_v20  ;;  %1222 = vmatpush.msra.mxu1 %v3118_v51  ;;  %v2998_v20 = vld [vmem:[%s4124_s4 + $0x90] sm:$0xff]  ;;  %v2992_v51 = vld [vmem:[%s4124_s4 + $0x60] sm:$0xff] }
 0x321   :  { %1772 = vmatpush.bf16.msra.mxu3 %v3001_v21  ;;  %1457 = vmatpush.bf16.msrb.mxu1 %v2987_v60  ;;  %v2993_v21 = vld [vmem:[%s4124_s4 + $0x68] sm:$0xff]  ;;  %v2988_v60 = vld [vmem:[%s4124_s4 + $0x40] sm:$0xff] }
 0x322   :  { %v3874_v9 = vpop.permute.xlu0 %1242  ;;  %1757 = vmatpush.bf16.msrb.mxu2 %v2995_v36  ;;  %1415 = vmatpush.bf16.msra.mxu0 %v2984_v28 }
 0x323   :  { %v1290_v38 = vmul.f32 %v3874_v9, %v3272_v7  ;;  %v2996_v7 = vld [vmem:[%s4124_s4 + $0x80] sm:$0xff] }
 0x325   :  { %1773 = vmatpush.bf16.msra.mxu3 %v3000_v41  ;;  %v1299_v29 = vsel %vm1291_vm5, %v1290_v38, -inf  ;;  %1458 = vmatpush.bf16.msrb.mxu1 %v2986_v50  ;;  %v3005_v50 = vld [vmem:[%s4124_s4 + $0xc8] sm:$0xff] }
 0x326   :  { %v1300_v52 = vrot.slane %v1299_v29, 4  ;;  %1758 = vmatpush.bf16.msrb.mxu2 %v2994_v13  ;;  %1783 = vmatpush.bf16.msrb.mxu0 %v3011_v40 }
 0x328   :  { %v1301_v32 = vmax.f32 %v1299_v29, %v1300_v52 }
 0x329   :  { %1774 = vmatpush.bf16.msra.mxu3 %v2999_v25  ;;  %v3008_v25 = vld [vmem:[%s4124_s4 + $0xe0] sm:$0xff] }
 0x32a   :  { %v1302_v58 = vrot.slane %v1301_v32, 2  ;;  %1759 = vmatpush.bf16.msrb.mxu2 %v2993_v21  ;;  %1784 = vmatpush.bf16.msrb.mxu0 %v3010_v24 }
 0x32c   :  { %v1303_v1 = vmax.f32 %v1301_v32, %v1302_v58  ;;  %v2990_v32 = vld [vmem:[%s4124_s4 + $0x50] sm:$0xff] }
 0x32d   :  { %1775 = vmatpush.bf16.msra.mxu3 %v2998_v20 }
 0x32e   :  { %v1304_v34 = vrot.slane %v1303_v1, 1  ;;  %1760 = vmatpush.bf16.msrb.mxu2 %v2992_v51  ;;  %1785 = vmatpush.bf16.msrb.mxu0 %v3009_v27 }
 0x330   :  { %v1305_v43 = vmax.f32 %v1303_v1, %v1304_v34  ;;  %v3006_v1 = vld [vmem:[%s4124_s4 + $0xd0] sm:$0xff] }
 0x331   :  { %1776 = vmatpush.bf16.msra.mxu3 %v2997_v2 }
 0x332   :  { %v1427_v8 = vpack.c.bf16 %v1305_v43, %v1305_v43  ;;  %1761 = vmatpush.bf16.msrb.mxu2 %v2991_v44  ;;  %1786 = vmatpush.bf16.msrb.mxu0 %v3008_v25 }
 0x334   :  { %v1431_v39 = vunpack.c.l.b16 %v1427_v8 }
 0x335   :  { %1777 = vmatpush.bf16.msra.mxu3 %v2996_v7 }
 0x336   :  { %v1432_v49 = vsel %vm1321_vm2, %v1431_v39, %v1430_v62  ;;  %1762 = vmatpush.bf16.msrb.mxu2 %v2990_v32  ;;  %1787 = vmatpush.bf16.msrb.mxu0 %v3007_v59 }
 0x337   :  { %v1433_v47 = vpack.c.b16 %v1432_v49, %v1432_v49 }
 0x338   :  { %1778 = vmatmul.bf16.vlgmr.msra.gmra.mxu3 %v1558_v31 }
 0x339   :  { %1434 = vrot.lane.b32.xlu1 %v1433_v47, %s3196_s0 }
 0x33a   :  { %1788 = vmatpush.bf16.msrb.mxu0 %v3006_v1 }
 0x33e   :  { %1789 = vmatpush.bf16.msrb.mxu0 %v3005_v50 }
 0x387   :  { %v1267_v39 = vpop.xlane.xlu2 %1266 }
 0x388   :  { %3129 = vrcp.f32 %v1267_v39 }
 0x38a   :  { %v1069_v46 = vpop.f32.mrf.mxu0 }
 0x393   :  { %v1124_v48 = vpop.f32.mrf.mxu3 }
 0x394   :  { %v1179_v53 = vmul.f32 %v1124_v48, %v1069_v46  ;;  %v1072_v54 = vpop.f32.mrf.mxu0 }
 0x396   :  { %2610 = vmatmul.msk.f32.vlgmr.msra.gmra.mxu1 %vm75_vm0, %v1179_v53  ;;  %v3004_v53 = vld [vmem:[%s4124_s4 + $0xc0] sm:$0xff] }
 0x397   :  { %1796 = vmatpush.bf16.msra.mxu1 %v3019_v22  ;;  %1790 = vmatpush.bf16.msrb.mxu0 %v3004_v53  ;;  %v2794_v53 = vld [vmem:[%s4125_s5 + $0x20] sm:$0xf] }
 0x39b   :  { %1797 = vmatpush.bf16.msra.mxu1 %v3018_v37  ;;  %v3908_v55 = vpop.f32.mrf.mxu3 }
 0x39c   :  { %v1176_v56 = vpop.f32.mrf.mxu0 }
 0x39d   :  { %v1180_v3 = vmul.f32 %v1176_v56, %v1072_v54 }
 0x39f   :  { %2611 = vmatmul.msk.f32.gmra.mxu1 %vm75_vm0, %v1180_v3 }
 0x3a0   :  { %1798 = vmatpush.bf16.msra.mxu1 %v3017_v57 }
 0x3a3   :  { %v1378_v4 = vpop.f32.mrf.mxu3 }
 0x3a4   :  { %1799 = vmatpush.bf16.msra.mxu1 %v3016_v63 }
 0x3a8   :  { %1800 = vmatpush.bf16.msra.mxu1 %v3015_v10 }
 0x3ab   :  { %v1435_v14 = vpop.permute.xlu1 %1434 }
 0x3ac   :  { %2647 = vmatmul.msk.bf16.vlgmr.msrb.gmra.mxu1 %vm75_vm0, %v1435_v14 }
 0x3ad   :  { %1801 = vmatpush.bf16.msra.mxu1 %v3014_v11 }
 0x3b1   :  { %1802 = vmatpush.bf16.msra.mxu1 %v3013_v16 }
 0x3b5   :  { %1803 = vmatpush.bf16.msra.mxu1 %v3012_v17 }
 0x3bb   :  { %v3930_v6 = vpop.f32.mrf.mxu3 }
 0x3bc   :  { %1804 = vmatmul.bf16.vlgmr.msra.gmra.mxu1 %v1560_v18 }
 0x3c3   :  { %v1781_v33 = vpop.f32.mrf.mxu3 }
 0x413   :  { %v1224_v41 = vpop.f32.mrf.mxu1 }
 0x414   :  { %v1225_v42 = vadd.f32 %v1224_v41, %v1199_v0 }
 0x416   :  { %v1244_v38 = vmul.f32 %v3842_v61, %v1225_v42  ;;  %v2989_v61 = vld [vmem:[%s4124_s4 + $0x48] sm:$0xff] }
 0x417   :  { %1763 = vmatpush.bf16.msrb.mxu2 %v2989_v61 }
 0x418   :  { %v1246_v29 = vsel %vm75_vm0, %v1244_v38, -inf  ;;  %v1269_v30 = vsel %vm75_vm0, %v1244_v38, 0.0 }
 0x419   :  { %v1247_v52 = vrot.slane %v1246_v29, 4  ;;  %v1270_v20 = vrot.slane %v1269_v30, 4 }
 0x41b   :  { %v1248_v58 = vmax.f32 %v1246_v29, %v1247_v52  ;;  %v1271_v2 = vadd.f32 %v1270_v20, %v1269_v30  ;;  %1764 = vmatpush.bf16.msrb.mxu2 %v2988_v60  ;;  %v1557_v29 = vpack.c.b16 %v3555_v26, %v3555_v26  ;;  %v1559_v30 = vpack.c.b16 %v3739_v35, %v3739_v35  ;;  %v71_v35 = vld [vmem:[%s4127_s7 + $0x5] ss:$0 sm:$0xff] }
 0x41c   :  { %v1227_v34 = vpop.f32.mrf.mxu1 }
 0x41d   :  { %v1249_v7 = vrot.slane %v1248_v58, 2  ;;  %v1272_v5 = vrot.slane %v1271_v2, 2  ;;  %v1228_v43 = vadd.f32 %v1227_v34, %v1199_v0  ;;  %v3130_v0 = vpop.eup %3129 }
 0x41e   :  { %v1284_v14 = vrot.slane %v3130_v0, 1 }
 0x41f   :  { %v1245_v8 = vmul.f32 %v3874_v9, %v1228_v43  ;;  %v1250_v62 = vmax.f32 %v1248_v58, %v1249_v7  ;;  %v1273_v31 = vadd.f32 %v1272_v5, %v1271_v2 }
 0x421   :  { %v1253_v49 = vsel %vm75_vm0, %v1245_v8, -inf  ;;  %v1276_v47 = vsel %vm75_vm0, %v1245_v8, 0.0  ;;  %v1251_v9 = vrot.slane %v1250_v62, 1  ;;  %v1274_v46 = vrot.slane %v1273_v31, 1 }
 0x422   :  { %v1254_v45 = vrot.slane %v1253_v49, 4  ;;  %v1277_v23 = vrot.slane %v1276_v47, 4 }
 0x423   :  { %v1252_v56 = vmax.f32 %v1250_v62, %v1251_v9  ;;  %v1275_v63 = vadd.f32 %v1274_v46, %v1273_v31 }
 0x424   :  { %v1255_v48 = vmax.f32 %v1253_v49, %v1254_v45  ;;  %v1278_v22 = vadd.f32 %v1277_v23, %v1276_v47 }
 0x425   :  { %v1315_v16 = vpack.c.bf16 %v1252_v56, %v1252_v56  ;;  %v1287_v33 = vmul.f32 %v3130_v0, %v1275_v63  ;;  %v3022_v63 = vld [vmem:[%s4125_s5 + $0xc] sm:$0xf0] }
 0x426   :  { %v1256_v54 = vrot.slane %v1255_v48, 2  ;;  %v1279_v37 = vrot.slane %v1278_v22, 2 }
 0x427   :  { %v1319_v19 = vunpack.c.l.b16 %v1315_v16  ;;  %v1384_v28 = vpack.c.bf16 %v1287_v33, %v1287_v33  ;;  %v3027_v16 = vld [vmem:[%s4125_s5 + $0x34] sm:$0xf0] }
 0x428   :  { %v1257_v57 = vmax.f32 %v1255_v48, %v1256_v54  ;;  %v1280_v3 = vadd.f32 %v1279_v37, %v1278_v22  ;;  %v3026_v54 = vld [vmem:[%s4125_s5 + $0x2c] sm:$0xf0]  ;;  %v3024_v37 = vld [vmem:[%s4125_s5 + $0x24] sm:$0xf] }
 0x429   :  { %v1460_v4 = vpop.f32.mrf.mxu1  ;;  %v1388_v27 = vunpack.c.l.b16 %v1384_v28  ;;  %v2795_v56 = vor.u32 %v3026_v54, %v2794_v53  ;;  %v3021_v28 = vld [vmem:[%s4125_s5 + $0xc] sm:$0xf]  ;;  %v3198_v54 = vmov 512.0  }
 0x42a   :  { %v1258_v10 = vrot.slane %v1257_v57, 1  ;;  %v1281_v11 = vrot.slane %v1280_v3, 1 }
 0x42c   :  { %v1259_v17 = vmax.f32 %v1257_v57, %v1258_v10  ;;  %v1282_v18 = vadd.f32 %v1281_v11, %v1280_v3  ;;  %v2796_v57 = vld [vmem:[%s4125_s5 + $0x30] sm:$0xf0]  ;;  %v2778_v3 = vld [vmem:[%s4125_s5] sm:$0xf]  ;;  %v2802_v11 = vld [vmem:[%s4125_s5 + $0x28] sm:$0xf] }
 0x42d   :  { %v2799_v0 = vor.u32 %v3024_v37, %v2796_v57  ;;  %v2780_v10 = vld [vmem:[%s4125_s5 + $0x10] sm:$0xf0] }
 0x42e   :  { %v1316_v12 = vpack.c.bf16 %v1259_v17, %v1259_v17  ;;  %v1288_v15 = vmul.f32 %v1284_v14, %v1282_v18  ;;  %v2779_v14 = vor.u32 %v3022_v63, %v2778_v3  ;;  %v3025_v17 = vld [vmem:[%s4125_s5 + $0x2c] sm:$0xf]  ;;  %v2804_v18 = vld [vmem:[%s4125_s5 + $0x38] sm:$0xf0] }
 0x42f   :  { %1924 = vmatpush.bf16.msrb.mxu3 %v2799_v0 }
 0x430   :  { %v1320_v36 = vunpack.c.l.b16 %v1316_v12  ;;  %v1385_v13 = vpack.c.bf16 %v1288_v15, %v1288_v15  ;;  %v2803_v12 = vor.u32 %v3027_v16, %v2802_v11  ;;  %v2807_v15 = vor.u32 %v3025_v17, %v2804_v18 }
 0x431   :  { %v1462_v40 = vpop.f32.mrf.mxu1 }
 0x432   :  { %v1389_v21 = vunpack.c.l.b16 %v1385_v13  ;;  %v1322_v24 = vsel %vm1321_vm2, %v1320_v36, %v1319_v19  ;;  %v2786_v19 = vld [vmem:[%s4125_s5 + $0x8] sm:$0xf]  ;;  %v3023_v36 = vld [vmem:[%s4125_s5 + $0x14] sm:$0xf0]  ;;  %v2788_v13 = vld [vmem:[%s4125_s5 + $0x18] sm:$0xf0]  ;;  %1950 = vmatpush.bf16.msrb.mxu1 %v2807_v15 }
 0x433   :  { %v1323_v51 = vpack.c.b16 %v1322_v24, %v1322_v24  ;;  %v2787_v40 = vor.u32 %v3023_v36, %v2786_v19 }
 0x434   :  { %v1390_v41 = vrot.slane %v1389_v21, 7  ;;  %v2791_v21 = vor.u32 %v3021_v28, %v2788_v13 }
 0x435   :  { %2620 = vmatmul.msk.bf16.vlgmr.msra.gmra.mxu2 %vm75_vm0, %v1323_v51 }
 0x436   :  { %v1391_v42 = vsel %vm1321_vm2, %v1390_v41, %v1388_v27  ;;  %1911 = vmatpush.bf16.msra.mxu2 %v2795_v56  ;;  %1951 = vmatpush.bf16.msrb.mxu1 %v2791_v21 }
 0x437   :  { %v1392_v44 = vpack.c.b16 %v1391_v42, %v1391_v42 }
 0x439   :  { %2638 = vmatmul.msk.bf16.vlgmr.msra.gmra.mxu0 %vm75_vm0, %v1392_v44  ;;  %v1805_v25 = vpop.f32.mrf.mxu1 }
 0x43a   :  { %1937 = vmatpush.bf16.msra.mxu0 %v2803_v12  ;;  %1912 = vmatpush.bf16.msra.mxu2 %v2779_v14 }
 0x43e   :  { %1938 = vmatpush.bf16.msra.mxu0 %v2787_v40 }
 0x441   :  { %v1807_v38 = vpop.f32.mrf.mxu1 }
 0x445   :  { %1765 = vmatmul.bf16.vlgmr.msrb.gmra.mxu2 %v1557_v29 }
 0x449   :  { %1791 = vmatmul.bf16.vlgmr.msrb.gmra.mxu0 %v1559_v30  ;;  %v72_v30 = vld [vmem:[%s4127_s7 + $0x6] ss:$0 sm:$0xff] }
 0x4b6   :  { %v1417_v52 = vpop.f32.mrf.mxu0 }
 0x4b8   :  { %v1348_v20 = vpop.f32.mrf.mxu2 }
 0x4b9   :  { %v1377_v58 = vadd.f32 %v3908_v55, %v1348_v20  ;;  %v3197_v55 = vmov 32.0  }
 0x4ba   :  { %3131 = vrcp.f32 %v3197_v55 }
 0x4bb   :  { %v1421_v1 = vadd.f32 %v1417_v52, %v1377_v58 }
 0x4bd   :  { %v1464_v5 = vadd.f32 %v1460_v4, %v1421_v1  ;;  %v3020_v4 = vld [vmem:[%s4125_s5 + $0x4] sm:$0xf]  ;;  %v2368_v1 = vld [vmem:[%s4127_s7 + $0x1] ss:$8 sm:$0xf] }
 0x4be   :  { %v1419_v32 = vpop.f32.mrf.mxu0  ;;  %v2783_v33 = vor.u32 %v3020_v4, %v2780_v10 }
 0x4bf   :  { %v73_v32 = vld [vmem:[%s4127_s7 + $0x7] ss:$0 sm:$0xff] }
 0x4c0   :  { %v1350_v59 = vpop.f32.mrf.mxu2  ;;  %v3132_v49 = vpop.eup %3131  ;;  %1925 = vmatpush.bf16.msrb.mxu3 %v2783_v33 }
 0x4c1   :  { %v1816_v47 = vmul.f32 32.0, %v3132_v49  ;;  %vm1820_vm8 = vweird.f32 %v3132_v49 }
 0x4c6   :  { %v1792_v2 = vpop.f32.mrf.mxu0 }
 0x4c8   :  { %v1766_v61 = vpop.f32.mrf.mxu2 }
 0x4c9   :  { %v1780_v34 = vadd.f32 %v3930_v6, %v1766_v61  ;;  %v1817_v6 = vsub.f32 1.0, %v1816_v47 }
 0x4cb   :  { %v1793_v7 = vadd.f32 %v1792_v2, %v1780_v34  ;;  %v1818_v60 = vmul.f32 %v3132_v49, %v1817_v6 }
 0x4cd   :  { %v1806_v43 = vadd.f32 %v1805_v25, %v1793_v7  ;;  %v1819_v50 = vadd.f32 %v3132_v49, %v1818_v60 }
 0x4ce   :  { %v1794_v26 = vpop.f32.mrf.mxu0 }
 0x4cf   :  { %v1809_v8 = vadd.f32 %v1806_v43, %v1464_v5  ;;  %v1821_v45 = vsel %vm1820_vm8, %v3132_v49, %v1819_v50  ;;  %v1856_v5 = vperm.slane %v2368_v1, 2  ;;  %v1854_v43 = vperm.slane %v2368_v1, 0 }
 0x4d0   :  { %v1768_v62 = vpop.f32.mrf.mxu2  ;;  %v1855_v26 = vperm.slane %v2368_v1, 1 }
 0x4d1   :  { %v1810_v31 = vadd.f32 %v1809_v8, %v71_v35  ;;  %v1857_v35 = vperm.slane %v2368_v1, 3  ;;  %v3031_v1 = vld [vmem:[#allocation3 + $0x18] sm:$0xff] }
 0x4d3   :  { %v1812_v39 = vsel %vm1811_vm7, %v1810_v31, 0.0 }
 0x4d4   :  { %1813 = vadd.xlane.f32.xlu0 %v1812_v39 }
 0x547   :  { %v1814_v23 = vpop.xlane.xlu0 %1813 }
 0x548   :  { %v1822_v9 = vmul.f32 %v1821_v45, %v1814_v23 }
 0x54a   :  { %v1823_v46 = vsub.f32 %v1810_v31, %v1822_v9 }
 0x54c   :  { %v1824_v48 = vmul.f32 %v1823_v46, %v1823_v46 }
 0x54e   :  { %v1825_v22 = vsel %vm1811_vm7, %v1824_v48, 0.0 }
 0x54f   :  { %1826 = vadd.xlane.f32.xlu1 %v1825_v22 }
 0x5c2   :  { %v1827_v24 = vpop.xlane.xlu1 %1826 }
 0x5c3   :  { %v1828_v51 = vmul.f32 %v1827_v24, %v1821_v45 }
 0x5c5   :  { %v1829_v27 = vadd.f32 1e-05, %v1828_v51  ;;  %v3035_v51 = vld [vmem:[#allocation3 + $0x38] sm:$0xff] }
 0x5c6   :  { %2298 = vmatpush.bf16.msrb.mxu2 %v3035_v51 }
 0x5c7   :  { %3133 = vrsqrt.f32 %v1829_v27  ;;  %vm1836_vm10 = vweird.f32 %v1829_v27 }
 0x5c8   :  { %3135 = vrcp.f32 %v3198_v54 }
 0x5cd   :  { %v3134_v41 = vpop.eup %3133 }
 0x5ce   :  { %v1831_v42 = vmul.f32 %v3134_v41, %v1829_v27  ;;  %vm1837_vm9 = vweird.f32 %v3134_v41  ;;  %v3136_v37 = vpop.eup %3135  ;;  %v3043_v27 = vld [vmem:[#allocation3 + $0x78] sm:$0xff] }
 0x5cf   :  { %vm1838_vm11 = vmor %vm1836_vm10, %vm1837_vm9  ;;  %v1968_v56 = vmul.f32 512.0, %v3136_v37  ;;  %vm1972_vm13 = vweird.f32 %v3136_v37  ;;  %2311 = vmatpush.bf16.msra.mxu3 %v3043_v27 }
 0x5d0   :  { %v1832_v44 = vmul.f32 %v3134_v41, %v1831_v42  ;;  %v3059_v42 = vld [vmem:[#allocation3 + $0xf8] sm:$0xff] }
 0x5d1   :  { %v1969_v57 = vsub.f32 1.0, %v1968_v56  ;;  %2337 = vmatpush.bf16.msra.mxu1 %v3059_v42 }
 0x5d2   :  { %v1833_v25 = vmul.f32 0.5, %v1832_v44  ;;  %v3034_v44 = vld [vmem:[#allocation3 + $0x30] sm:$0xff] }
 0x5d3   :  { %v1970_v3 = vmul.f32 %v3136_v37, %v1969_v57  ;;  %2299 = vmatpush.bf16.msrb.mxu2 %v3034_v44 }
 0x5d4   :  { %v1834_v38 = vsub.f32 1.5, %v1833_v25  ;;  %v3042_v25 = vld [vmem:[#allocation3 + $0x70] sm:$0xff] }
 0x5d5   :  { %v1971_v63 = vadd.f32 %v3136_v37, %v1970_v3  ;;  %2312 = vmatpush.bf16.msra.mxu3 %v3042_v25 }
 0x5d6   :  { %v1835_v29 = vmul.f32 %v3134_v41, %v1834_v38  ;;  %v3050_v38 = vld [vmem:[#allocation3 + $0xb0] sm:$0xff] }
 0x5d7   :  { %v4080_v0 = vsel %vm1972_vm13, %v3136_v37, %v1971_v63  ;;  %v2370_v37 = vld [vmem:[%s4127_s7 + $0x3] ss:$8 sm:$0xf] }
 0x5d8   :  { %v1839_v52 = vsel %vm1838_vm11, %v3134_v41, %v1835_v29  ;;  %v3051_v41 = vld [vmem:[#allocation3 + $0xb8] sm:$0xff]  ;;  %v3058_v29 = vld [vmem:[#allocation3 + $0xf0] sm:$0xff]  ;;  %v2022_v3 = vperm.slane %v2370_v37, 0 }
 0x5d9   :  { %v1840_v20 = vmul.f32 %v1839_v52, %v1823_v46  ;;  %2324 = vmatpush.bf16.msrb.mxu0 %v3051_v41  ;;  %2338 = vmatpush.bf16.msra.mxu1 %v3058_v29  ;;  %v3041_v52 = vld [vmem:[#allocation3 + $0x68] sm:$0xff] }
 0x5da   :  { %2313 = vmatpush.bf16.msra.mxu3 %v3041_v52 }
 0x5db   :  { %v1841_v59 = vmul.f32 %v1840_v20, %v72_v30  ;;  %v3033_v30 = vld [vmem:[#allocation3 + $0x28] sm:$0xff] }
 0x5dc   :  { %v3049_v20 = vld [vmem:[#allocation3 + $0xa8] sm:$0xff]  ;;  %2300 = vmatpush.bf16.msrb.mxu2 %v3033_v30 }
 0x5dd   :  { %v1842_v58 = vadd.f32 %v1841_v59, %v73_v32  ;;  %2325 = vmatpush.bf16.msrb.mxu0 %v3050_v38  ;;  %v3057_v32 = vld [vmem:[#allocation3 + $0xe8] sm:$0xff]  ;;  %v3032_v59 = vld [vmem:[#allocation3 + $0x20] sm:$0xff] }
 0x5de   :  { %2339 = vmatpush.bf16.msra.mxu1 %v3057_v32 }
 0x5df   :  { %v1843_v2 = vmax.f32 %v1842_v58, 0.0  ;;  %v3040_v58 = vld [vmem:[#allocation3 + $0x60] sm:$0xff] }
 0x5e0   :  { %2301 = vmatpush.bf16.msrb.mxu2 %v3032_v59  ;;  %2314 = vmatpush.bf16.msra.mxu3 %v3040_v58 }
 0x5e1   :  { %v1852_v61 = vpack.c.bf16 %v1843_v2, %v1843_v2  ;;  %2326 = vmatpush.bf16.msrb.mxu0 %v3049_v20  ;;  %v3048_v2 = vld [vmem:[#allocation3 + $0xa0] sm:$0xff] }
 0x5e2   :  { %v74_v20 = vld [vmem:[%s4127_s7 + $0x20] ss:$0 sm:$0xff] }
 0x5e3   :  { %2808 = vmatmul.msk.bf16.vlgmr.msra.gmra.mxu2 %vm75_vm0, %v1852_v61  ;;  %2809 = vmatmul.msk.bf16.vlgmr.msrb.gmra.mxu3 %vm75_vm0, %v1852_v61 }
 0x5e4   :  { %2810 = vmatmul.msk.bf16.vlgmr.msra.gmra.mxu0 %vm75_vm0, %v1852_v61  ;;  %2811 = vmatmul.msk.bf16.vlgmr.msrb.gmra.mxu1 %vm75_vm0, %v1852_v61  ;;  %v3056_v61 = vld [vmem:[#allocation3 + $0xe0] sm:$0xff] }
 0x5e5   :  { %2327 = vmatpush.bf16.msrb.mxu0 %v3048_v2  ;;  %2340 = vmatpush.bf16.msra.mxu1 %v3056_v61 }
 0x5e6   :  { %2302 = vmatpush.bf16.msrb.mxu2 %v3031_v1 }
 0x661   :  { %v1940_v34 = vpop.f32.mrf.mxu0  ;;  %v1953_v7 = vpop.f32.mrf.mxu1 }
 0x662   :  { %v1941_v31 = vadd.f32 %v1940_v34, %v1856_v5  ;;  %v1954_v49 = vadd.f32 %v1953_v7, %v1857_v35  ;;  %v3039_v34 = vld [vmem:[#allocation3 + $0x58] sm:$0xff]  ;;  %v3046_v35 = vld [vmem:[#allocation3 + $0x90] sm:$0xff] }
 0x663   :  { %v3047_v7 = vld [vmem:[#allocation3 + $0x98] sm:$0xff]  ;;  %2315 = vmatpush.bf16.msra.mxu3 %v3039_v34 }
 0x664   :  { %v1961_v23 = vsel %vm1957_vm12, %v1941_v31, 0.0  ;;  %v1963_v46 = vsel %vm1957_vm12, %v1954_v49, 0.0  ;;  %v3055_v5 = vld [vmem:[#allocation3 + $0xd8] sm:$0xff]  ;;  %2328 = vmatpush.bf16.msrb.mxu0 %v3047_v7 }
 0x665   :  { %2341 = vmatpush.bf16.msra.mxu1 %v3055_v5 }
 0x666   :  { %v1914_v8 = vpop.f32.mrf.mxu2  ;;  %v1927_v62 = vpop.f32.mrf.mxu3 }
 0x667   :  { %v1915_v39 = vadd.f32 %v1914_v8, %v1854_v43  ;;  %v1928_v55 = vadd.f32 %v1927_v62, %v1855_v26  ;;  %v3030_v43 = vld [vmem:[#allocation3 + $0x10] sm:$0xff]  ;;  %v3029_v62 = vld [vmem:[#allocation3 + $0x8] sm:$0xff] }
 0x668   :  { %v3038_v26 = vld [vmem:[#allocation3 + $0x50] sm:$0xff]  ;;  %2303 = vmatpush.bf16.msrb.mxu2 %v3030_v43  ;;  %2329 = vmatpush.bf16.msrb.mxu0 %v3046_v35 }
 0x669   :  { %v1958_v47 = vsel %vm1957_vm12, %v1915_v39, 0.0  ;;  %v1959_v6 = vsel %vm1957_vm12, %v1928_v55, 0.0  ;;  %v1942_v60 = vpop.f32.mrf.mxu0  ;;  %v1955_v50 = vpop.f32.mrf.mxu1  ;;  %v3054_v8 = vld [vmem:[#allocation3 + $0xd0] sm:$0xff]  ;;  %2316 = vmatpush.bf16.msra.mxu3 %v3038_v26 }
 0x66a   :  { %v1960_v45 = vadd.f32 %v1959_v6, %v1958_v47  ;;  %2342 = vmatpush.bf16.msra.mxu1 %v3054_v8  ;;  %v3036_v47 = vld [vmem:[#allocation3 + $0x40] sm:$0xff] }
 0x66b   :  { %v3044_v6 = vld [vmem:[#allocation3 + $0x80] sm:$0xff] }
 0x66c   :  { %v1962_v9 = vadd.f32 %v1961_v23, %v1960_v45  ;;  %2304 = vmatpush.bf16.msrb.mxu2 %v3029_v62  ;;  %v3052_v60 = vld [vmem:[#allocation3 + $0xc0] sm:$0xff] }
 0x66e   :  { %v1916_v48 = vpop.f32.mrf.mxu2  ;;  %v1929_v22 = vpop.f32.mrf.mxu3  ;;  %v1964_v53 = vadd.f32 %v1963_v46, %v1962_v9 }
 0x670   :  { %1965 = vadd.xlane.f32.xlu2 %v1964_v53  ;;  %v2369_v53 = vld [vmem:[%s4127_s7 + $0x2] ss:$8 sm:$0xf] }
 0x671   :  { %v2009_v57 = vperm.slane %v2369_v53, 0  ;;  %v2010_v63 = vperm.slane %v2369_v53, 1 }
 0x6e3   :  { %v1966_v4 = vpop.xlane.xlu2 %1965 }
 0x6e4   :  { %v1974_v10 = vmul.f32 %v4080_v0, %v1966_v4  ;;  %v2012_v4 = vperm.slane %v2369_v53, 3 }
 0x6e6   :  { %v4083_v11 = vsub.f32 %v1915_v39, %v1974_v10  ;;  %v4085_v14 = vsub.f32 %v1928_v55, %v1974_v10  ;;  %v4087_v16 = vsub.f32 %v1941_v31, %v1974_v10  ;;  %v4089_v17 = vsub.f32 %v1954_v49, %v1974_v10  ;;  %v3037_v31 = vld [vmem:[#allocation3 + $0x48] sm:$0xff]  ;;  %v3028_v49 = vld [vmem:[#allocation3] sm:$0xff] }
 0x6e7   :  { %v3045_v39 = vld [vmem:[#allocation3 + $0x88] sm:$0xff]  ;;  %2317 = vmatpush.bf16.msra.mxu3 %v3037_v31  ;;  %2305 = vmatpush.bf16.msrb.mxu2 %v3028_v49 }
 0x6e8   :  { %v1979_v18 = vmul.f32 %v4083_v11, %v4083_v11  ;;  %v1980_v33 = vmul.f32 %v4085_v14, %v4085_v14  ;;  %v1981_v12 = vmul.f32 %v4087_v16, %v4087_v16  ;;  %v1982_v15 = vmul.f32 %v4089_v17, %v4089_v17  ;;  %v3053_v55 = vld [vmem:[#allocation3 + $0xc8] sm:$0xff]  ;;  %2330 = vmatpush.bf16.msrb.mxu0 %v3045_v39 }
 0x6e9   :  { %2343 = vmatpush.bf16.msra.mxu1 %v3053_v55 }
 0x6ea   :  { %v1983_v19 = vsel %vm1957_vm12, %v1979_v18, 0.0  ;;  %v1984_v36 = vsel %vm1957_vm12, %v1980_v33, 0.0  ;;  %v1986_v13 = vsel %vm1957_vm12, %v1981_v12, 0.0  ;;  %v1988_v21 = vsel %vm1957_vm12, %v1982_v15, 0.0 }
 0x6eb   :  { %v1985_v28 = vadd.f32 %v1984_v36, %v1983_v19  ;;  %2318 = vmatpush.bf16.msra.mxu3 %v3036_v47  ;;  %v2023_v18 = vperm.slane %v2370_v37, 1  ;;  %v2024_v33 = vperm.slane %v2370_v37, 2  ;;  %v2025_v12 = vperm.slane %v2370_v37, 3 }
 0x6ec   :  { %2331 = vmatpush.bf16.msrb.mxu0 %v3044_v6 }
 0x6ed   :  { %v1987_v40 = vadd.f32 %v1986_v13, %v1985_v28  ;;  %2344 = vmatpush.bf16.msra.mxu1 %v3052_v60 }
 0x6ef   :  { %v1989_v24 = vadd.f32 %v1988_v21, %v1987_v40 }
 0x6f1   :  { %1990 = vadd.xlane.f32.xlu2 %v1989_v24 }
 0x764   :  { %v1991_v50 = vpop.xlane.xlu2 %1990 }
 0x765   :  { %v1992_v45 = vmul.f32 %v1991_v50, %v4080_v0  ;;  %v2011_v0 = vperm.slane %v2369_v53, 2 }
 0x767   :  { %v1993_v23 = vadd.f32 1e-05, %v1992_v45 }
 0x769   :  { %3137 = vrsqrt.f32 %v1993_v23  ;;  %vm2000_vm15 = vweird.f32 %v1993_v23 }
 0x76f   :  { %v3138_v9 = vpop.eup %3137 }
 0x770   :  { %v1995_v46 = vmul.f32 %v3138_v9, %v1993_v23  ;;  %vm2001_vm14 = vweird.f32 %v3138_v9 }
 0x771   :  { %vm2002_vm0 = vmor %vm2000_vm15, %vm2001_vm14 }
 0x772   :  { %v1996_v48 = vmul.f32 %v3138_v9, %v1995_v46 }
 0x774   :  { %v1997_v22 = vmul.f32 0.5, %v1996_v48 }
 0x776   :  { %v1998_v54 = vsub.f32 1.5, %v1997_v22 }
 0x778   :  { %v1999_v56 = vmul.f32 %v3138_v9, %v1998_v54 }
 0x77a   :  { %v2003_v10 = vsel %vm2002_vm0, %v3138_v9, %v1999_v56 }
 0x77b   :  { %v2004_v15 = vmul.f32 %v2003_v10, %v4083_v11  ;;  %v2005_v19 = vmul.f32 %v2003_v10, %v4085_v14  ;;  %v2006_v36 = vmul.f32 %v2003_v10, %v4087_v16  ;;  %v2007_v28 = vmul.f32 %v2003_v10, %v4089_v17 }
 0x77d   :  { %v2017_v13 = vmul.f32 %v2009_v57, %v2004_v15  ;;  %v2018_v40 = vmul.f32 %v2010_v63, %v2005_v19  ;;  %v2019_v21 = vmul.f32 %v2011_v0, %v2006_v36  ;;  %v2020_v24 = vmul.f32 %v2012_v4, %v2007_v28 }
 0x77f   :  { %v2030_v51 = vadd.f32 %v2022_v3, %v2017_v13  ;;  %v2031_v27 = vadd.f32 %v2023_v18, %v2018_v40  ;;  %v2032_v41 = vadd.f32 %v2024_v33, %v2019_v21  ;;  %v2033_v42 = vadd.f32 %v2025_v12, %v2020_v24 }
 0x781   :  { %v2034_v44 = vmax.f32 %v2030_v51, 0.0  ;;  %v2035_v25 = vmax.f32 %v2031_v27, 0.0  ;;  %v2036_v38 = vmax.f32 %v2032_v41, 0.0  ;;  %v2037_v29 = vmax.f32 %v2033_v42, 0.0 }
 0x783   :  { %v2102_v30 = vpack.c.bf16 %v2034_v44, %v2034_v44  ;;  %v2103_v11 = vpack.c.bf16 %v2035_v25, %v2035_v25  ;;  %v2104_v52 = vpack.c.bf16 %v2036_v38, %v2036_v38  ;;  %v2105_v14 = vpack.c.bf16 %v2037_v29, %v2037_v29 }
 0x785   :  { %2306 = vmatmul.bf16.vlgmr.msrb.gmra.mxu2 %v2102_v30  ;;  %2319 = vmatmul.bf16.vlgmr.msra.gmra.mxu3 %v2103_v11 }
 0x786   :  { %2332 = vmatmul.bf16.vlgmr.msrb.gmra.mxu0 %v2104_v52  ;;  %2345 = vmatmul.bf16.vlgmr.msra.gmra.mxu1 %v2105_v14 }
 0x803   :  { %v2333_v16 = vpop.f32.mrf.mxu0  ;;  %v2346_v17 = vpop.f32.mrf.mxu1 }
 0x808   :  { %v2307_v32 = vpop.f32.mrf.mxu2  ;;  %v2320_v59 = vpop.f32.mrf.mxu3 }
 0x809   :  { %v2308_v58 = vadd.f32 %v2307_v32, %v74_v20 }
 0x80b   :  { %v2321_v2 = vadd.f32 %v2320_v59, %v2308_v58  ;;  %v2335_v61 = vpop.f32.mrf.mxu0  ;;  %v2348_v1 = vpop.f32.mrf.mxu1 }
 0x80d   :  { %v2334_v34 = vadd.f32 %v2333_v16, %v2321_v2 }
 0x80f   :  { %v2347_v7 = vadd.f32 %v2346_v17, %v2334_v34 }
 0x810   :  { %v2309_v5 = vpop.f32.mrf.mxu2  ;;  %v2322_v43 = vpop.f32.mrf.mxu3 }
 0x811   :  { %2350 = vst [vmem:[#allocation6] sm:$0x3] %v2347_v7 }
 0x812   :  { %2361 = dma.vmem_to_hbm [thread:$0]  %s2357_s3, 32, %s2359_s23, [#allocation5]  }
 0x813   :  { %3189 = dma.done.wait [#allocation5], 32  }
 0x814   :  { %3190 = vsyncadd [#allocation5], 4294967264 }
 0x815   :  { %2366 = vsyncpa [#allocation4], 1 }
 0x816   :  { %2367 = vsyncpa [#allocation5], 1 }

</bundles_post_ra>
